<compile_context>
chip_gen: v7x
topology: tpu7x:2x2x1
jax: 0.10.0
libtpu: 0.0.40
codegen_flags: <defaults>
</compile_context>

<pallas_src>
import numpy as np

import jax
import jax.numpy as jnp
from jax import lax
from jax.experimental import pallas as pl
from jax.experimental.pallas import tpu as pltpu


# ---------------------------------------------------------------------------
# Fused kernel: entire UNet forward for one image per grid step.
# Activation layout: 2-D (H, W*C), lane index = w*C + c ("lane-dense").
# After a pool the columns stay "spread" (stride 2C); the next layer's weight
# matrix is built for that spread layout, so no lane compaction is needed.
# ---------------------------------------------------------------------------
def _unet_kernel(x_ref,
                 B1, b1, B2, b2, M1, bT1, B3, b3, M2, bT2, B4, b4, B5, b5,
                 o_ref, pad_scr, asm_scr):
    f32 = jnp.float32

    def mm(a, b):
        return jnp.dot(a, b, preferred_element_type=f32)

    def conv(x, B_ref, bias_ref, relu):
        # 3x3 "same" conv.  x: (H, Wi).  B_ref: (3, Wi, W*Cout) -- one block-
        # structured matrix per vertical tap dy (horizontal taps + horizontal
        # zero padding are folded into the matrix).  Vertical zero padding is
        # done with two zero rows in the pad scratch.
        H, Wi = x.shape
        zrow = jnp.zeros((1, Wi), f32)
        pad_scr[0:1, 0:Wi] = zrow
        pad_scr[H + 1:H + 2, 0:Wi] = zrow
        pad_scr[1:H + 1, 0:Wi] = x
        acc = bias_ref[...]                               # (1, W*Cout) broadcast
        acc = acc + mm(pad_scr[0:H, 0:Wi], B_ref[0])      # tap dy = 0
        acc = acc + mm(pad_scr[1:H + 1, 0:Wi], B_ref[1])  # tap dy = 1
        acc = acc + mm(pad_scr[2:H + 2, 0:Wi], B_ref[2])  # tap dy = 2
        if relu:
            acc = jnp.maximum(acc, 0.0)
        return acc                                        # (H, W*Cout), dense lanes

    def pool(a, C):
        # 2x2 max pool, stride 2.  a: (H, W*C) dense.  Row pairs are reduced
        # with an unrolled exact max; column pairs by comparing against the
        # C-lane-shifted copy.  Output (H/2, W*C - C): valid values live at
        # lanes 2*wo*C + c (the next layer's weight matrix expects exactly
        # that spread layout, so garbage lanes hit all-zero weight rows).
        H, WC = a.shape
        Ho, Wi = H // 2, WC - C
        for ho in range(Ho):
            rm = jnp.maximum(a[2 * ho:2 * ho + 1, :], a[2 * ho + 1:2 * ho + 2, :])
            asm_scr[ho:ho + 1, 0:Wi] = jnp.maximum(rm[:, 0:Wi], rm[:, C:WC])
        return asm_scr[0:Ho, 0:Wi]

    def convT(x, M_ref, bias_ref):
        # ConvTranspose2d(k=2, s=2).  x: (H, Wi).  M_ref: (2, Wi, 2*W*Cout),
        # one matrix per output row parity dy; rows are interleaved into the
        # scratch (pixel shuffle done in VMEM, output comes back dense).
        H = x.shape[0]
        W2 = M_ref.shape[2]
        y0 = mm(x, M_ref[0]) + bias_ref[...]
        y1 = mm(x, M_ref[1]) + bias_ref[...]
        for h in range(H):
            asm_scr[2 * h:2 * h + 1, 0:W2] = y0[h:h + 1, :]
            asm_scr[2 * h + 1:2 * h + 2, 0:W2] = y1[h:h + 1, :]
        return asm_scr[0:2 * H, 0:W2]

    # ---- encoder -> decoder -> last_conv (mirrors UnetFromPretrained.forward)
    x = x_ref[0]                            # (16, 64)   = (H, W*4)
    a = conv(x, B1, b1, relu=True)          # (16, 128)  Conv 4->8 + ReLU
    a = pool(a, C=8)                        # (8, 120)   MaxPool2d(2)
    a = conv(a, B2, b2, relu=True)          # (8, 128)   Conv 8->16 + ReLU
    a = pool(a, C=16)                       # (4, 112)   MaxPool2d(2)
    a = convT(a, M1, bT1)                   # (8, 128)   ConvT 16->16
    a = conv(a, B3, b3, relu=False)         # (8, 64)    Conv 16->8
    a = convT(a, M2, bT2)                   # (16, 128)  ConvT 8->8
    a = conv(a, B4, b4, relu=False)         # (16, 64)   Conv 8->4
    a = conv(a, B5, b5, relu=False)         # (16, 48)   last_conv 4->3
    o_ref[0] = a


_WORDER = ("B1", "b1", "B2", "b2", "M1", "bT1", "B3", "b3",
           "M2", "bT2", "B4", "b4", "B5", "b5")


def _fused_call(x2d, mats):
    N, H, Win = x2d.shape
    outw = mats["b5"].shape[1]
    weights = [mats[k] for k in _WORDER]
    in_specs = [pl.BlockSpec((1, H, Win), lambda i: (i, 0, 0))]
    for a in weights:
        # Whole array per step; block index constant -> not re-fetched per step.
        in_specs.append(pl.BlockSpec(a.shape, lambda i, nd=a.ndim: (0,) * nd))
    return pl.pallas_call(
        _unet_kernel,
        out_shape=jax.ShapeDtypeStruct((N, H, outw), jnp.float32),
        grid=(N,),
        in_specs=in_specs,
        out_specs=pl.BlockSpec((1, H, outw), lambda i: (i, 0, 0)),
        scratch_shapes=[pltpu.VMEM((18, 128), jnp.float32),   # padded conv input
                        pltpu.VMEM((16, 128), jnp.float32)],  # pool / convT assembly
        compiler_params=pltpu.CompilerParams(dimension_semantics=("parallel",)),
    )(x2d, *weights)


@jax.jit
def unet_forward(mats, x_nchw):
    """Forward pass, NCHW in / NCHW out (like the PyTorch module)."""
    N, C, H, W = x_nchw.shape
    x2d = jnp.transpose(x_nchw, (0, 2, 3, 1)).reshape(N, H, W * C)
    out2d = _fused_call(x2d, mats)
    num_classes = mats["b5"].shape[1] // W
    out = out2d.reshape(N, H, W, num_classes)
    return jnp.transpose(out, (0, 3, 1, 2))


# ---------------------------------------------------------------------------
# One-time host-side weight restructuring (PyTorch-layout -> lane-dense mats).
# in_stride = lane stride between spatial columns of the layer's input
# (Cin for dense inputs, 2*Cin for "spread" pooled inputs); in_width = number
# of input lanes.
# ---------------------------------------------------------------------------
def _conv_mats(w_pt, b, W, in_stride, in_width):
    w = np.asarray(w_pt, np.float32)                       # (Cout, Cin, 3, 3)
    Cout, Cin = int(w.shape[0]), int(w.shape[1])
    B = np.zeros((3, in_width, W * Cout), np.float32)
    for dy in range(3):
        for dx in range(3):
            for wc in range(W):
                ws = wc + dx - 1                           # input col (padding=1)
                if 0 <= ws < W:
                    B[dy,
                      ws * in_stride: ws * in_stride + Cin,
                      wc * Cout: (wc + 1) * Cout] = w[:, :, dy, dx].T
    bias = np.tile(np.asarray(b, np.float32), W)[None, :]
    return jnp.asarray(B), jnp.asarray(bias)


def _convT_mats(w_pt, b, W, in_stride, in_width):
    w = np.asarray(w_pt, np.float32)                       # (Cin, Cout, 2, 2)
    Cin, Cout = int(w.shape[0]), int(w.shape[1])
    M = np.zeros((2, in_width, 2 * W * Cout), np.float32)
    for dy in range(2):
        for dx in range(2):
            for wc in range(W):
                M[dy,
                  wc * in_stride: wc * in_stride + Cin,
                  (2 * wc + dx) * Cout: (2 * wc + dx + 1) * Cout] = w[:, :, dy, dx]
    bias = np.tile(np.asarray(b, np.float32), 2 * W)[None, :]
    return jnp.asarray(M), jnp.asarray(bias)


def prepare_params(params):
    m = {}
    m["B1"], m["b1"] = _conv_mats(*params["enc_conv1"], W=16, in_stride=4, in_width=64)
    m["B2"], m["b2"] = _conv_mats(*params["enc_conv2"], W=8, in_stride=16, in_width=120)
    m["M1"], m["bT1"] = _convT_mats(*params["dec_convT1"], W=4, in_stride=32, in_width=112)
    m["B3"], m["b3"] = _conv_mats(*params["dec_conv1"], W=8, in_stride=16, in_width=128)
    m["M2"], m["bT2"] = _convT_mats(*params["dec_convT2"], W=8, in_stride=8, in_width=64)
    m["B4"], m["b4"] = _conv_mats(*params["dec_conv2"], W=16, in_stride=8, in_width=128)
    m["B5"], m["b5"] = _conv_mats(*params["last_conv"], W=16, in_stride=4, in_width=64)
    return m


# ---------------------------------------------------------------------------
# Deterministic synthetic parameters (PyTorch-layout tensors)
# ---------------------------------------------------------------------------
def init_params(key):
    def conv_p(k, cin, cout, ks):
        k1, k2 = jax.random.split(k)
        w = jax.random.normal(k1, (cout, cin, ks, ks), jnp.float32) / jnp.sqrt(cin * ks * ks)
        b = 0.01 * jax.random.normal(k2, (cout,), jnp.float32)
        return w, b

    def convT_p(k, cin, cout, ks):
        k1, k2 = jax.random.split(k)
        w = jax.random.normal(k1, (cin, cout, ks, ks), jnp.float32) / jnp.sqrt(cin * ks * ks)
        b = 0.01 * jax.random.normal(k2, (cout,), jnp.float32)
        return w, b

    ks = jax.random.split(key, 7)
    return {
        "enc_conv1": conv_p(ks[0], 4, 8, 3),
        "enc_conv2": conv_p(ks[1], 8, 16, 3),
        "dec_convT1": convT_p(ks[2], 16, 16, 2),
        "dec_conv1": conv_p(ks[3], 16, 8, 3),
        "dec_convT2": convT_p(ks[4], 8, 8, 2),
        "dec_conv2": conv_p(ks[5], 8, 4, 3),
        "last_conv": conv_p(ks[6], 4, 3, 3),
    }


# ---------------------------------------------------------------------------
# Pure-JAX reference (independent implementation) for verification
# ---------------------------------------------------------------------------
def ref_forward(params, x_nchw):
    x = jnp.transpose(x_nchw, (0, 2, 3, 1))

    def conv(x, w_pt, b, relu=False):
        w = jnp.transpose(w_pt, (2, 3, 1, 0))              # HWIO
        y = lax.conv_general_dilated(
            x, w, (1, 1), ((1, 1), (1, 1)),
            dimension_numbers=("NHWC", "HWIO", "NHWC")) + b
        return jnp.maximum(y, 0.0) if relu else y

    def pool(x):
        return lax.reduce_window(x, -jnp.inf, lax.max,
                                 (1, 2, 2, 1), (1, 2, 2, 1), "VALID")

    def convT(x, w_pt, b):
        N, H, W, Cin = x.shape
        Cout = w_pt.shape[1]
        t = jnp.einsum("nhwi,ioab->nhawbo", x, w_pt)
        return t.reshape(N, 2 * H, 2 * W, Cout) + b

    x = conv(x, *params["enc_conv1"], relu=True); x = pool(x)
    x = conv(x, *params["enc_conv2"], relu=True); x = pool(x)
    x = convT(x, *params["dec_convT1"])
    x = conv(x, *params["dec_conv1"])
    x = convT(x, *params["dec_convT2"])
    x = conv(x, *params["dec_conv2"])
    x = conv(x, *params["last_conv"])
    return jnp.transpose(x, (0, 3, 1, 2))


if __name__ == "__main__":
    key = jax.random.PRNGKey(0)
    pkey, xkey = jax.random.split(key)
    params = init_params(pkey)
    x = jax.random.normal(xkey, (2, 4, 16, 16), jnp.float32)   # NCHW, like PyTorch

    mats = prepare_params(params)                              # one-time host glue
    out = jax.block_until_ready(unet_forward(mats, x))
    ref = jax.block_until_ready(ref_forward(params, x))

    assert out.shape == (2, 3, 16, 16), out.shape              # num_classes = 3
    max_err = float(jnp.max(jnp.abs(out - ref)))
    # tolerance covers MXU f32-pass / summation-order differences vs XLA convs
    assert jnp.allclose(out, ref, atol=1e-3, rtol=1e-3), max_err
    print("KERNEL_OK")
</pallas_src>

<mosaic_0001>
module attributes {stable_mosaic.version = 11 : i64} {
  func.func @_unet_kernel(%arg0: i32, %arg1: memref<1x16x64xf32, #tpu.memory_space<vmem>>, %arg2: memref<3x64x128xf32, #tpu.memory_space<vmem>>, %arg3: memref<1x128xf32, #tpu.memory_space<vmem>>, %arg4: memref<3x120x128xf32, #tpu.memory_space<vmem>>, %arg5: memref<1x128xf32, #tpu.memory_space<vmem>>, %arg6: memref<2x112x128xf32, #tpu.memory_space<vmem>>, %arg7: memref<1x128xf32, #tpu.memory_space<vmem>>, %arg8: memref<3x128x64xf32, #tpu.memory_space<vmem>>, %arg9: memref<1x64xf32, #tpu.memory_space<vmem>>, %arg10: memref<2x64x128xf32, #tpu.memory_space<vmem>>, %arg11: memref<1x128xf32, #tpu.memory_space<vmem>>, %arg12: memref<3x128x64xf32, #tpu.memory_space<vmem>>, %arg13: memref<1x64xf32, #tpu.memory_space<vmem>>, %arg14: memref<3x64x48xf32, #tpu.memory_space<vmem>>, %arg15: memref<1x48xf32, #tpu.memory_space<vmem>>, %arg16: memref<1x16x48xf32, #tpu.memory_space<vmem>>, %arg17: memref<18x128xf32, #tpu.memory_space<vmem>>, %arg18: memref<16x128xf32, #tpu.memory_space<vmem>>) attributes {dimension_semantics = [#tpu.dimension_semantics<parallel>], iteration_bounds = array<i64: 2>, scalar_prefetch = 0 : i64, scratch_operands = 2 : i64, tpu.core_type = #tpu.core_type<tc>, window_params = [{transform_indices = @transform_0, window_bounds = array<i64: 1, 16, 64>}, {pipeline_mode = #tpu.pipeline_mode<synchronous>, transform_indices = @transform_1, window_bounds = array<i64: 3, 64, 128>}, {pipeline_mode = #tpu.pipeline_mode<synchronous>, transform_indices = @transform_2, window_bounds = array<i64: 1, 128>}, {pipeline_mode = #tpu.pipeline_mode<synchronous>, transform_indices = @transform_3, window_bounds = array<i64: 3, 120, 128>}, {pipeline_mode = #tpu.pipeline_mode<synchronous>, transform_indices = @transform_4, window_bounds = array<i64: 1, 128>}, {pipeline_mode = #tpu.pipeline_mode<synchronous>, transform_indices = @transform_5, window_bounds = array<i64: 2, 112, 128>}, {pipeline_mode = #tpu.pipeline_mode<synchronous>, transform_indices = @transform_6, window_bounds = array<i64: 1, 128>}, {pipeline_mode = #tpu.pipeline_mode<synchronous>, transform_indices = @transform_7, window_bounds = array<i64: 3, 128, 64>}, {pipeline_mode = #tpu.pipeline_mode<synchronous>, transform_indices = @transform_8, window_bounds = array<i64: 1, 64>}, {pipeline_mode = #tpu.pipeline_mode<synchronous>, transform_indices = @transform_9, window_bounds = array<i64: 2, 64, 128>}, {pipeline_mode = #tpu.pipeline_mode<synchronous>, transform_indices = @transform_10, window_bounds = array<i64: 1, 128>}, {pipeline_mode = #tpu.pipeline_mode<synchronous>, transform_indices = @transform_11, window_bounds = array<i64: 3, 128, 64>}, {pipeline_mode = #tpu.pipeline_mode<synchronous>, transform_indices = @transform_12, window_bounds = array<i64: 1, 64>}, {pipeline_mode = #tpu.pipeline_mode<synchronous>, transform_indices = @transform_13, window_bounds = array<i64: 3, 64, 48>}, {pipeline_mode = #tpu.pipeline_mode<synchronous>, transform_indices = @transform_14, window_bounds = array<i64: 1, 48>}, {transform_indices = @transform_15, window_bounds = array<i64: 1, 16, 48>}]} {
    %c0 = arith.constant 0 : index
    %c0_0 = arith.constant 0 : index
    %c0_1 = arith.constant 0 : index
    %0 = vector.load %arg1[%c0, %c0_0, %c0_1] : memref<1x16x64xf32, #tpu.memory_space<vmem>>, vector<1x16x64xf32>
    %1 = vector.shape_cast %0 : vector<1x16x64xf32> to vector<16x64xf32>
    %cst = arith.constant 0.000000e+00 : f32
    %2 = vector.broadcast %cst : f32 to vector<1x64xf32>
    %c0_2 = arith.constant 0 : index
    %c0_3 = arith.constant 0 : index
    %3 = vector.load %arg17[%c0_2, %c0_3] : memref<18x128xf32, #tpu.memory_space<vmem>>, vector<1x64xf32>
    tpu.vector_store %arg17[%c0_2, %c0_3], %2 {strides = array<i32>} : memref<18x128xf32, #tpu.memory_space<vmem>>, vector<1x64xf32>,
    %c17 = arith.constant 17 : index
    %c0_4 = arith.constant 0 : index
    %4 = vector.load %arg17[%c17, %c0_4] : memref<18x128xf32, #tpu.memory_space<vmem>>, vector<1x64xf32>
    tpu.vector_store %arg17[%c17, %c0_4], %2 {strides = array<i32>} : memref<18x128xf32, #tpu.memory_space<vmem>>, vector<1x64xf32>,
    %c1 = arith.constant 1 : index
    %c0_5 = arith.constant 0 : index
    %5 = vector.load %arg17[%c1, %c0_5] : memref<18x128xf32, #tpu.memory_space<vmem>>, vector<16x64xf32>
    tpu.vector_store %arg17[%c1, %c0_5], %1 {strides = array<i32>} : memref<18x128xf32, #tpu.memory_space<vmem>>, vector<16x64xf32>,
    %c0_6 = arith.constant 0 : index
    %c0_7 = arith.constant 0 : index
    %6 = vector.load %arg3[%c0_6, %c0_7] : memref<1x128xf32, #tpu.memory_space<vmem>>, vector<1x128xf32>
    %c0_8 = arith.constant 0 : index
    %c0_9 = arith.constant 0 : index
    %7 = vector.load %arg17[%c0_8, %c0_9] : memref<18x128xf32, #tpu.memory_space<vmem>>, vector<16x64xf32>
    %c0_10 = arith.constant 0 : index
    %c0_11 = arith.constant 0 : index
    %c0_12 = arith.constant 0 : index
    %8 = vector.load %arg2[%c0_10, %c0_11, %c0_12] : memref<3x64x128xf32, #tpu.memory_space<vmem>>, vector<1x64x128xf32>
    %9 = vector.shape_cast %8 : vector<1x64x128xf32> to vector<64x128xf32>
    %cst_13 = arith.constant dense<0.000000e+00> : vector<16x128xf32>
    %10 = tpu.matmul %7, %9, %cst_13 {dimension_numbers = #tpu.dot_dimension_numbers<[1], [0], [0], [1], [0, 0, 1, 1], [], []>} : vector<16x64xf32>, vector<64x128xf32>, vector<16x128xf32> -> vector<16x128xf32>
    %11 = vector.broadcast %6 : vector<1x128xf32> to vector<16x128xf32>
    %12 = arith.addf %11, %10 : vector<16x128xf32>
    %c1_14 = arith.constant 1 : index
    %c0_15 = arith.constant 0 : index
    %13 = vector.load %arg17[%c1_14, %c0_15] : memref<18x128xf32, #tpu.memory_space<vmem>>, vector<16x64xf32>
    %c1_16 = arith.constant 1 : index
    %c0_17 = arith.constant 0 : index
    %c0_18 = arith.constant 0 : index
    %14 = vector.load %arg2[%c1_16, %c0_17, %c0_18] : memref<3x64x128xf32, #tpu.memory_space<vmem>>, vector<1x64x128xf32>
    %15 = vector.shape_cast %14 : vector<1x64x128xf32> to vector<64x128xf32>
    %cst_19 = arith.constant dense<0.000000e+00> : vector<16x128xf32>
    %16 = tpu.matmul %13, %15, %cst_19 {dimension_numbers = #tpu.dot_dimension_numbers<[1], [0], [0], [1], [0, 0, 1, 1], [], []>} : vector<16x64xf32>, vector<64x128xf32>, vector<16x128xf32> -> vector<16x128xf32>
    %17 = arith.addf %12, %16 : vector<16x128xf32>
    %c2 = arith.constant 2 : index
    %c0_20 = arith.constant 0 : index
    %18 = vector.load %arg17[%c2, %c0_20] : memref<18x128xf32, #tpu.memory_space<vmem>>, vector<16x64xf32>
    %c2_21 = arith.constant 2 : index
    %c0_22 = arith.constant 0 : index
    %c0_23 = arith.constant 0 : index
    %19 = vector.load %arg2[%c2_21, %c0_22, %c0_23] : memref<3x64x128xf32, #tpu.memory_space<vmem>>, vector<1x64x128xf32>
    %20 = vector.shape_cast %19 : vector<1x64x128xf32> to vector<64x128xf32>
    %cst_24 = arith.constant dense<0.000000e+00> : vector<16x128xf32>
    %21 = tpu.matmul %18, %20, %cst_24 {dimension_numbers = #tpu.dot_dimension_numbers<[1], [0], [0], [1], [0, 0, 1, 1], [], []>} : vector<16x64xf32>, vector<64x128xf32>, vector<16x128xf32> -> vector<16x128xf32>
    %22 = arith.addf %17, %21 : vector<16x128xf32>
    %cst_25 = arith.constant 0.000000e+00 : f32
    %23 = vector.broadcast %cst_25 : f32 to vector<16x128xf32>
    %24 = arith.maximumf %22, %23 : vector<16x128xf32>
    %25 = vector.extract_strided_slice %24 {offsets = [0, 0], sizes = [1, 128], strides = [1, 1]} : vector<16x128xf32> to vector<1x128xf32>
    %26 = vector.extract_strided_slice %24 {offsets = [1, 0], sizes = [1, 128], strides = [1, 1]} : vector<16x128xf32> to vector<1x128xf32>
    %27 = arith.maximumf %25, %26 : vector<1x128xf32>
    %28 = vector.extract_strided_slice %27 {offsets = [0, 0], sizes = [1, 120], strides = [1, 1]} : vector<1x128xf32> to vector<1x120xf32>
    %29 = vector.extract_strided_slice %27 {offsets = [0, 8], sizes = [1, 120], strides = [1, 1]} : vector<1x128xf32> to vector<1x120xf32>
    %30 = arith.maximumf %28, %29 : vector<1x120xf32>
    %c0_26 = arith.constant 0 : index
    %c0_27 = arith.constant 0 : index
    %31 = vector.load %arg18[%c0_26, %c0_27] : memref<16x128xf32, #tpu.memory_space<vmem>>, vector<1x120xf32>
    tpu.vector_store %arg18[%c0_26, %c0_27], %30 {strides = array<i32>} : memref<16x128xf32, #tpu.memory_space<vmem>>, vector<1x120xf32>,
    %32 = vector.extract_strided_slice %24 {offsets = [2, 0], sizes = [1, 128], strides = [1, 1]} : vector<16x128xf32> to vector<1x128xf32>
    %33 = vector.extract_strided_slice %24 {offsets = [3, 0], sizes = [1, 128], strides = [1, 1]} : vector<16x128xf32> to vector<1x128xf32>
    %34 = arith.maximumf %32, %33 : vector<1x128xf32>
    %35 = vector.extract_strided_slice %34 {offsets = [0, 0], sizes = [1, 120], strides = [1, 1]} : vector<1x128xf32> to vector<1x120xf32>
    %36 = vector.extract_strided_slice %34 {offsets = [0, 8], sizes = [1, 120], strides = [1, 1]} : vector<1x128xf32> to vector<1x120xf32>
    %37 = arith.maximumf %35, %36 : vector<1x120xf32>
    %c1_28 = arith.constant 1 : index
    %c0_29 = arith.constant 0 : index
    %38 = vector.load %arg18[%c1_28, %c0_29] : memref<16x128xf32, #tpu.memory_space<vmem>>, vector<1x120xf32>
    tpu.vector_store %arg18[%c1_28, %c0_29], %37 {strides = array<i32>} : memref<16x128xf32, #tpu.memory_space<vmem>>, vector<1x120xf32>,
    %39 = vector.extract_strided_slice %24 {offsets = [4, 0], sizes = [1, 128], strides = [1, 1]} : vector<16x128xf32> to vector<1x128xf32>
    %40 = vector.extract_strided_slice %24 {offsets = [5, 0], sizes = [1, 128], strides = [1, 1]} : vector<16x128xf32> to vector<1x128xf32>
    %41 = arith.maximumf %39, %40 : vector<1x128xf32>
    %42 = vector.extract_strided_slice %41 {offsets = [0, 0], sizes = [1, 120], strides = [1, 1]} : vector<1x128xf32> to vector<1x120xf32>
    %43 = vector.extract_strided_slice %41 {offsets = [0, 8], sizes = [1, 120], strides = [1, 1]} : vector<1x128xf32> to vector<1x120xf32>
    %44 = arith.maximumf %42, %43 : vector<1x120xf32>
    %c2_30 = arith.constant 2 : index
    %c0_31 = arith.constant 0 : index
    %45 = vector.load %arg18[%c2_30, %c0_31] : memref<16x128xf32, #tpu.memory_space<vmem>>, vector<1x120xf32>
    tpu.vector_store %arg18[%c2_30, %c0_31], %44 {strides = array<i32>} : memref<16x128xf32, #tpu.memory_space<vmem>>, vector<1x120xf32>,
    %46 = vector.extract_strided_slice %24 {offsets = [6, 0], sizes = [1, 128], strides = [1, 1]} : vector<16x128xf32> to vector<1x128xf32>
    %47 = vector.extract_strided_slice %24 {offsets = [7, 0], sizes = [1, 128], strides = [1, 1]} : vector<16x128xf32> to vector<1x128xf32>
    %48 = arith.maximumf %46, %47 : vector<1x128xf32>
    %49 = vector.extract_strided_slice %48 {offsets = [0, 0], sizes = [1, 120], strides = [1, 1]} : vector<1x128xf32> to vector<1x120xf32>
    %50 = vector.extract_strided_slice %48 {offsets = [0, 8], sizes = [1, 120], strides = [1, 1]} : vector<1x128xf32> to vector<1x120xf32>
    %51 = arith.maximumf %49, %50 : vector<1x120xf32>
    %c3 = arith.constant 3 : index
    %c0_32 = arith.constant 0 : index
    %52 = vector.load %arg18[%c3, %c0_32] : memref<16x128xf32, #tpu.memory_space<vmem>>, vector<1x120xf32>
    tpu.vector_store %arg18[%c3, %c0_32], %51 {strides = array<i32>} : memref<16x128xf32, #tpu.memory_space<vmem>>, vector<1x120xf32>,
    %53 = vector.extract_strided_slice %24 {offsets = [8, 0], sizes = [1, 128], strides = [1, 1]} : vector<16x128xf32> to vector<1x128xf32>
    %54 = vector.extract_strided_slice %24 {offsets = [9, 0], sizes = [1, 128], strides = [1, 1]} : vector<16x128xf32> to vector<1x128xf32>
    %55 = arith.maximumf %53, %54 : vector<1x128xf32>
    %56 = vector.extract_strided_slice %55 {offsets = [0, 0], sizes = [1, 120], strides = [1, 1]} : vector<1x128xf32> to vector<1x120xf32>
    %57 = vector.extract_strided_slice %55 {offsets = [0, 8], sizes = [1, 120], strides = [1, 1]} : vector<1x128xf32> to vector<1x120xf32>
    %58 = arith.maximumf %56, %57 : vector<1x120xf32>
    %c4 = arith.constant 4 : index
    %c0_33 = arith.constant 0 : index
    %59 = vector.load %arg18[%c4, %c0_33] : memref<16x128xf32, #tpu.memory_space<vmem>>, vector<1x120xf32>
    tpu.vector_store %arg18[%c4, %c0_33], %58 {strides = array<i32>} : memref<16x128xf32, #tpu.memory_space<vmem>>, vector<1x120xf32>,
    %60 = vector.extract_strided_slice %24 {offsets = [10, 0], sizes = [1, 128], strides = [1, 1]} : vector<16x128xf32> to vector<1x128xf32>
    %61 = vector.extract_strided_slice %24 {offsets = [11, 0], sizes = [1, 128], strides = [1, 1]} : vector<16x128xf32> to vector<1x128xf32>
    %62 = arith.maximumf %60, %61 : vector<1x128xf32>
    %63 = vector.extract_strided_slice %62 {offsets = [0, 0], sizes = [1, 120], strides = [1, 1]} : vector<1x128xf32> to vector<1x120xf32>
    %64 = vector.extract_strided_slice %62 {offsets = [0, 8], sizes = [1, 120], strides = [1, 1]} : vector<1x128xf32> to vector<1x120xf32>
    %65 = arith.maximumf %63, %64 : vector<1x120xf32>
    %c5 = arith.constant 5 : index
    %c0_34 = arith.constant 0 : index
    %66 = vector.load %arg18[%c5, %c0_34] : memref<16x128xf32, #tpu.memory_space<vmem>>, vector<1x120xf32>
    tpu.vector_store %arg18[%c5, %c0_34], %65 {strides = array<i32>} : memref<16x128xf32, #tpu.memory_space<vmem>>, vector<1x120xf32>,
    %67 = vector.extract_strided_slice %24 {offsets = [12, 0], sizes = [1, 128], strides = [1, 1]} : vector<16x128xf32> to vector<1x128xf32>
    %68 = vector.extract_strided_slice %24 {offsets = [13, 0], sizes = [1, 128], strides = [1, 1]} : vector<16x128xf32> to vector<1x128xf32>
    %69 = arith.maximumf %67, %68 : vector<1x128xf32>
    %70 = vector.extract_strided_slice %69 {offsets = [0, 0], sizes = [1, 120], strides = [1, 1]} : vector<1x128xf32> to vector<1x120xf32>
    %71 = vector.extract_strided_slice %69 {offsets = [0, 8], sizes = [1, 120], strides = [1, 1]} : vector<1x128xf32> to vector<1x120xf32>
    %72 = arith.maximumf %70, %71 : vector<1x120xf32>
    %c6 = arith.constant 6 : index
    %c0_35 = arith.constant 0 : index
    %73 = vector.load %arg18[%c6, %c0_35] : memref<16x128xf32, #tpu.memory_space<vmem>>, vector<1x120xf32>
    tpu.vector_store %arg18[%c6, %c0_35], %72 {strides = array<i32>} : memref<16x128xf32, #tpu.memory_space<vmem>>, vector<1x120xf32>,
    %74 = vector.extract_strided_slice %24 {offsets = [14, 0], sizes = [1, 128], strides = [1, 1]} : vector<16x128xf32> to vector<1x128xf32>
    %75 = vector.extract_strided_slice %24 {offsets = [15, 0], sizes = [1, 128], strides = [1, 1]} : vector<16x128xf32> to vector<1x128xf32>
    %76 = arith.maximumf %74, %75 : vector<1x128xf32>
    %77 = vector.extract_strided_slice %76 {offsets = [0, 0], sizes = [1, 120], strides = [1, 1]} : vector<1x128xf32> to vector<1x120xf32>
    %78 = vector.extract_strided_slice %76 {offsets = [0, 8], sizes = [1, 120], strides = [1, 1]} : vector<1x128xf32> to vector<1x120xf32>
    %79 = arith.maximumf %77, %78 : vector<1x120xf32>
    %c7 = arith.constant 7 : index
    %c0_36 = arith.constant 0 : index
    %80 = vector.load %arg18[%c7, %c0_36] : memref<16x128xf32, #tpu.memory_space<vmem>>, vector<1x120xf32>
    tpu.vector_store %arg18[%c7, %c0_36], %79 {strides = array<i32>} : memref<16x128xf32, #tpu.memory_space<vmem>>, vector<1x120xf32>,
    %c0_37 = arith.constant 0 : index
    %c0_38 = arith.constant 0 : index
    %81 = vector.load %arg18[%c0_37, %c0_38] : memref<16x128xf32, #tpu.memory_space<vmem>>, vector<8x120xf32>
    %cst_39 = arith.constant 0.000000e+00 : f32
    %82 = vector.broadcast %cst_39 : f32 to vector<1x120xf32>
    %c0_40 = arith.constant 0 : index
    %c0_41 = arith.constant 0 : index
    %83 = vector.load %arg17[%c0_40, %c0_41] : memref<18x128xf32, #tpu.memory_space<vmem>>, vector<1x120xf32>
    tpu.vector_store %arg17[%c0_40, %c0_41], %82 {strides = array<i32>} : memref<18x128xf32, #tpu.memory_space<vmem>>, vector<1x120xf32>,
    %c9 = arith.constant 9 : index
    %c0_42 = arith.constant 0 : index
    %84 = vector.load %arg17[%c9, %c0_42] : memref<18x128xf32, #tpu.memory_space<vmem>>, vector<1x120xf32>
    tpu.vector_store %arg17[%c9, %c0_42], %82 {strides = array<i32>} : memref<18x128xf32, #tpu.memory_space<vmem>>, vector<1x120xf32>,
    %c1_43 = arith.constant 1 : index
    %c0_44 = arith.constant 0 : index
    %85 = vector.load %arg17[%c1_43, %c0_44] : memref<18x128xf32, #tpu.memory_space<vmem>>, vector<8x120xf32>
    tpu.vector_store %arg17[%c1_43, %c0_44], %81 {strides = array<i32>} : memref<18x128xf32, #tpu.memory_space<vmem>>, vector<8x120xf32>,
    %c0_45 = arith.constant 0 : index
    %c0_46 = arith.constant 0 : index
    %86 = vector.load %arg5[%c0_45, %c0_46] : memref<1x128xf32, #tpu.memory_space<vmem>>, vector<1x128xf32>
    %c0_47 = arith.constant 0 : index
    %c0_48 = arith.constant 0 : index
    %87 = vector.load %arg17[%c0_47, %c0_48] : memref<18x128xf32, #tpu.memory_space<vmem>>, vector<8x120xf32>
    %c0_49 = arith.constant 0 : index
    %c0_50 = arith.constant 0 : index
    %c0_51 = arith.constant 0 : index
    %88 = vector.load %arg4[%c0_49, %c0_50, %c0_51] : memref<3x120x128xf32, #tpu.memory_space<vmem>>, vector<1x120x128xf32>
    %89 = vector.shape_cast %88 : vector<1x120x128xf32> to vector<120x128xf32>
    %cst_52 = arith.constant dense<0.000000e+00> : vector<8x128xf32>
    %90 = tpu.matmul %87, %89, %cst_52 {dimension_numbers = #tpu.dot_dimension_numbers<[1], [0], [0], [1], [0, 0, 1, 1], [], []>} : vector<8x120xf32>, vector<120x128xf32>, vector<8x128xf32> -> vector<8x128xf32>
    %91 = vector.broadcast %86 : vector<1x128xf32> to vector<8x128xf32>
    %92 = arith.addf %91, %90 : vector<8x128xf32>
    %c1_53 = arith.constant 1 : index
    %c0_54 = arith.constant 0 : index
    %93 = vector.load %arg17[%c1_53, %c0_54] : memref<18x128xf32, #tpu.memory_space<vmem>>, vector<8x120xf32>
    %c1_55 = arith.constant 1 : index
    %c0_56 = arith.constant 0 : index
    %c0_57 = arith.constant 0 : index
    %94 = vector.load %arg4[%c1_55, %c0_56, %c0_57] : memref<3x120x128xf32, #tpu.memory_space<vmem>>, vector<1x120x128xf32>
    %95 = vector.shape_cast %94 : vector<1x120x128xf32> to vector<120x128xf32>
    %cst_58 = arith.constant dense<0.000000e+00> : vector<8x128xf32>
    %96 = tpu.matmul %93, %95, %cst_58 {dimension_numbers = #tpu.dot_dimension_numbers<[1], [0], [0], [1], [0, 0, 1, 1], [], []>} : vector<8x120xf32>, vector<120x128xf32>, vector<8x128xf32> -> vector<8x128xf32>
    %97 = arith.addf %92, %96 : vector<8x128xf32>
    %c2_59 = arith.constant 2 : index
    %c0_60 = arith.constant 0 : index
    %98 = vector.load %arg17[%c2_59, %c0_60] : memref<18x128xf32, #tpu.memory_space<vmem>>, vector<8x120xf32>
    %c2_61 = arith.constant 2 : index
    %c0_62 = arith.constant 0 : index
    %c0_63 = arith.constant 0 : index
    %99 = vector.load %arg4[%c2_61, %c0_62, %c0_63] : memref<3x120x128xf32, #tpu.memory_space<vmem>>, vector<1x120x128xf32>
    %100 = vector.shape_cast %99 : vector<1x120x128xf32> to vector<120x128xf32>
    %cst_64 = arith.constant dense<0.000000e+00> : vector<8x128xf32>
    %101 = tpu.matmul %98, %100, %cst_64 {dimension_numbers = #tpu.dot_dimension_numbers<[1], [0], [0], [1], [0, 0, 1, 1], [], []>} : vector<8x120xf32>, vector<120x128xf32>, vector<8x128xf32> -> vector<8x128xf32>
    %102 = arith.addf %97, %101 : vector<8x128xf32>
    %cst_65 = arith.constant 0.000000e+00 : f32
    %103 = vector.broadcast %cst_65 : f32 to vector<8x128xf32>
    %104 = arith.maximumf %102, %103 : vector<8x128xf32>
    %105 = vector.extract_strided_slice %104 {offsets = [0, 0], sizes = [1, 128], strides = [1, 1]} : vector<8x128xf32> to vector<1x128xf32>
    %106 = vector.extract_strided_slice %104 {offsets = [1, 0], sizes = [1, 128], strides = [1, 1]} : vector<8x128xf32> to vector<1x128xf32>
    %107 = arith.maximumf %105, %106 : vector<1x128xf32>
    %108 = vector.extract_strided_slice %107 {offsets = [0, 0], sizes = [1, 112], strides = [1, 1]} : vector<1x128xf32> to vector<1x112xf32>
    %109 = vector.extract_strided_slice %107 {offsets = [0, 16], sizes = [1, 112], strides = [1, 1]} : vector<1x128xf32> to vector<1x112xf32>
    %110 = arith.maximumf %108, %109 : vector<1x112xf32>
    %c0_66 = arith.constant 0 : index
    %c0_67 = arith.constant 0 : index
    %111 = vector.load %arg18[%c0_66, %c0_67] : memref<16x128xf32, #tpu.memory_space<vmem>>, vector<1x112xf32>
    tpu.vector_store %arg18[%c0_66, %c0_67], %110 {strides = array<i32>} : memref<16x128xf32, #tpu.memory_space<vmem>>, vector<1x112xf32>,
    %112 = vector.extract_strided_slice %104 {offsets = [2, 0], sizes = [1, 128], strides = [1, 1]} : vector<8x128xf32> to vector<1x128xf32>
    %113 = vector.extract_strided_slice %104 {offsets = [3, 0], sizes = [1, 128], strides = [1, 1]} : vector<8x128xf32> to vector<1x128xf32>
    %114 = arith.maximumf %112, %113 : vector<1x128xf32>
    %115 = vector.extract_strided_slice %114 {offsets = [0, 0], sizes = [1, 112], strides = [1, 1]} : vector<1x128xf32> to vector<1x112xf32>
    %116 = vector.extract_strided_slice %114 {offsets = [0, 16], sizes = [1, 112], strides = [1, 1]} : vector<1x128xf32> to vector<1x112xf32>
    %117 = arith.maximumf %115, %116 : vector<1x112xf32>
    %c1_68 = arith.constant 1 : index
    %c0_69 = arith.constant 0 : index
    %118 = vector.load %arg18[%c1_68, %c0_69] : memref<16x128xf32, #tpu.memory_space<vmem>>, vector<1x112xf32>
    tpu.vector_store %arg18[%c1_68, %c0_69], %117 {strides = array<i32>} : memref<16x128xf32, #tpu.memory_space<vmem>>, vector<1x112xf32>,
    %119 = vector.extract_strided_slice %104 {offsets = [4, 0], sizes = [1, 128], strides = [1, 1]} : vector<8x128xf32> to vector<1x128xf32>
    %120 = vector.extract_strided_slice %104 {offsets = [5, 0], sizes = [1, 128], strides = [1, 1]} : vector<8x128xf32> to vector<1x128xf32>
    %121 = arith.maximumf %119, %120 : vector<1x128xf32>
    %122 = vector.extract_strided_slice %121 {offsets = [0, 0], sizes = [1, 112], strides = [1, 1]} : vector<1x128xf32> to vector<1x112xf32>
    %123 = vector.extract_strided_slice %121 {offsets = [0, 16], sizes = [1, 112], strides = [1, 1]} : vector<1x128xf32> to vector<1x112xf32>
    %124 = arith.maximumf %122, %123 : vector<1x112xf32>
    %c2_70 = arith.constant 2 : index
    %c0_71 = arith.constant 0 : index
    %125 = vector.load %arg18[%c2_70, %c0_71] : memref<16x128xf32, #tpu.memory_space<vmem>>, vector<1x112xf32>
    tpu.vector_store %arg18[%c2_70, %c0_71], %124 {strides = array<i32>} : memref<16x128xf32, #tpu.memory_space<vmem>>, vector<1x112xf32>,
    %126 = vector.extract_strided_slice %104 {offsets = [6, 0], sizes = [1, 128], strides = [1, 1]} : vector<8x128xf32> to vector<1x128xf32>
    %127 = vector.extract_strided_slice %104 {offsets = [7, 0], sizes = [1, 128], strides = [1, 1]} : vector<8x128xf32> to vector<1x128xf32>
    %128 = arith.maximumf %126, %127 : vector<1x128xf32>
    %129 = vector.extract_strided_slice %128 {offsets = [0, 0], sizes = [1, 112], strides = [1, 1]} : vector<1x128xf32> to vector<1x112xf32>
    %130 = vector.extract_strided_slice %128 {offsets = [0, 16], sizes = [1, 112], strides = [1, 1]} : vector<1x128xf32> to vector<1x112xf32>
    %131 = arith.maximumf %129, %130 : vector<1x112xf32>
    %c3_72 = arith.constant 3 : index
    %c0_73 = arith.constant 0 : index
    %132 = vector.load %arg18[%c3_72, %c0_73] : memref<16x128xf32, #tpu.memory_space<vmem>>, vector<1x112xf32>
    tpu.vector_store %arg18[%c3_72, %c0_73], %131 {strides = array<i32>} : memref<16x128xf32, #tpu.memory_space<vmem>>, vector<1x112xf32>,
    %c0_74 = arith.constant 0 : index
    %c0_75 = arith.constant 0 : index
    %133 = vector.load %arg18[%c0_74, %c0_75] : memref<16x128xf32, #tpu.memory_space<vmem>>, vector<4x112xf32>
    %c0_76 = arith.constant 0 : index
    %c0_77 = arith.constant 0 : index
    %c0_78 = arith.constant 0 : index
    %134 = vector.load %arg6[%c0_76, %c0_77, %c0_78] : memref<2x112x128xf32, #tpu.memory_space<vmem>>, vector<1x112x128xf32>
    %135 = vector.shape_cast %134 : vector<1x112x128xf32> to vector<112x128xf32>
    %cst_79 = arith.constant dense<0.000000e+00> : vector<4x128xf32>
    %136 = tpu.matmul %133, %135, %cst_79 {dimension_numbers = #tpu.dot_dimension_numbers<[1], [0], [0], [1], [0, 0, 1, 1], [], []>} : vector<4x112xf32>, vector<112x128xf32>, vector<4x128xf32> -> vector<4x128xf32>
    %c0_80 = arith.constant 0 : index
    %c0_81 = arith.constant 0 : index
    %137 = vector.load %arg7[%c0_80, %c0_81] : memref<1x128xf32, #tpu.memory_space<vmem>>, vector<1x128xf32>
    %138 = vector.broadcast %137 : vector<1x128xf32> to vector<4x128xf32>
    %139 = arith.addf %136, %138 : vector<4x128xf32>
    %c1_82 = arith.constant 1 : index
    %c0_83 = arith.constant 0 : index
    %c0_84 = arith.constant 0 : index
    %140 = vector.load %arg6[%c1_82, %c0_83, %c0_84] : memref<2x112x128xf32, #tpu.memory_space<vmem>>, vector<1x112x128xf32>
    %141 = vector.shape_cast %140 : vector<1x112x128xf32> to vector<112x128xf32>
    %cst_85 = arith.constant dense<0.000000e+00> : vector<4x128xf32>
    %142 = tpu.matmul %133, %141, %cst_85 {dimension_numbers = #tpu.dot_dimension_numbers<[1], [0], [0], [1], [0, 0, 1, 1], [], []>} : vector<4x112xf32>, vector<112x128xf32>, vector<4x128xf32> -> vector<4x128xf32>
    %c0_86 = arith.constant 0 : index
    %c0_87 = arith.constant 0 : index
    %143 = vector.load %arg7[%c0_86, %c0_87] : memref<1x128xf32, #tpu.memory_space<vmem>>, vector<1x128xf32>
    %144 = vector.broadcast %143 : vector<1x128xf32> to vector<4x128xf32>
    %145 = arith.addf %142, %144 : vector<4x128xf32>
    %146 = vector.extract_strided_slice %139 {offsets = [0, 0], sizes = [1, 128], strides = [1, 1]} : vector<4x128xf32> to vector<1x128xf32>
    %c0_88 = arith.constant 0 : index
    %c0_89 = arith.constant 0 : index
    %147 = vector.load %arg18[%c0_88, %c0_89] : memref<16x128xf32, #tpu.memory_space<vmem>>, vector<1x128xf32>
    tpu.vector_store %arg18[%c0_88, %c0_89], %146 {strides = array<i32>} : memref<16x128xf32, #tpu.memory_space<vmem>>, vector<1x128xf32>,
    %148 = vector.extract_strided_slice %145 {offsets = [0, 0], sizes = [1, 128], strides = [1, 1]} : vector<4x128xf32> to vector<1x128xf32>
    %c1_90 = arith.constant 1 : index
    %c0_91 = arith.constant 0 : index
    %149 = vector.load %arg18[%c1_90, %c0_91] : memref<16x128xf32, #tpu.memory_space<vmem>>, vector<1x128xf32>
    tpu.vector_store %arg18[%c1_90, %c0_91], %148 {strides = array<i32>} : memref<16x128xf32, #tpu.memory_space<vmem>>, vector<1x128xf32>,
    %150 = vector.extract_strided_slice %139 {offsets = [1, 0], sizes = [1, 128], strides = [1, 1]} : vector<4x128xf32> to vector<1x128xf32>
    %c2_92 = arith.constant 2 : index
    %c0_93 = arith.constant 0 : index
    %151 = vector.load %arg18[%c2_92, %c0_93] : memref<16x128xf32, #tpu.memory_space<vmem>>, vector<1x128xf32>
    tpu.vector_store %arg18[%c2_92, %c0_93], %150 {strides = array<i32>} : memref<16x128xf32, #tpu.memory_space<vmem>>, vector<1x128xf32>,
    %152 = vector.extract_strided_slice %145 {offsets = [1, 0], sizes = [1, 128], strides = [1, 1]} : vector<4x128xf32> to vector<1x128xf32>
    %c3_94 = arith.constant 3 : index
    %c0_95 = arith.constant 0 : index
    %153 = vector.load %arg18[%c3_94, %c0_95] : memref<16x128xf32, #tpu.memory_space<vmem>>, vector<1x128xf32>
    tpu.vector_store %arg18[%c3_94, %c0_95], %152 {strides = array<i32>} : memref<16x128xf32, #tpu.memory_space<vmem>>, vector<1x128xf32>,
    %154 = vector.extract_strided_slice %139 {offsets = [2, 0], sizes = [1, 128], strides = [1, 1]} : vector<4x128xf32> to vector<1x128xf32>
    %c4_96 = arith.constant 4 : index
    %c0_97 = arith.constant 0 : index
    %155 = vector.load %arg18[%c4_96, %c0_97] : memref<16x128xf32, #tpu.memory_space<vmem>>, vector<1x128xf32>
    tpu.vector_store %arg18[%c4_96, %c0_97], %154 {strides = array<i32>} : memref<16x128xf32, #tpu.memory_space<vmem>>, vector<1x128xf32>,
    %156 = vector.extract_strided_slice %145 {offsets = [2, 0], sizes = [1, 128], strides = [1, 1]} : vector<4x128xf32> to vector<1x128xf32>
    %c5_98 = arith.constant 5 : index
    %c0_99 = arith.constant 0 : index
    %157 = vector.load %arg18[%c5_98, %c0_99] : memref<16x128xf32, #tpu.memory_space<vmem>>, vector<1x128xf32>
    tpu.vector_store %arg18[%c5_98, %c0_99], %156 {strides = array<i32>} : memref<16x128xf32, #tpu.memory_space<vmem>>, vector<1x128xf32>,
    %158 = vector.extract_strided_slice %139 {offsets = [3, 0], sizes = [1, 128], strides = [1, 1]} : vector<4x128xf32> to vector<1x128xf32>
    %c6_100 = arith.constant 6 : index
    %c0_101 = arith.constant 0 : index
    %159 = vector.load %arg18[%c6_100, %c0_101] : memref<16x128xf32, #tpu.memory_space<vmem>>, vector<1x128xf32>
    tpu.vector_store %arg18[%c6_100, %c0_101], %158 {strides = array<i32>} : memref<16x128xf32, #tpu.memory_space<vmem>>, vector<1x128xf32>,
    %160 = vector.extract_strided_slice %145 {offsets = [3, 0], sizes = [1, 128], strides = [1, 1]} : vector<4x128xf32> to vector<1x128xf32>
    %c7_102 = arith.constant 7 : index
    %c0_103 = arith.constant 0 : index
    %161 = vector.load %arg18[%c7_102, %c0_103] : memref<16x128xf32, #tpu.memory_space<vmem>>, vector<1x128xf32>
    tpu.vector_store %arg18[%c7_102, %c0_103], %160 {strides = array<i32>} : memref<16x128xf32, #tpu.memory_space<vmem>>, vector<1x128xf32>,
    %c0_104 = arith.constant 0 : index
    %c0_105 = arith.constant 0 : index
    %162 = vector.load %arg18[%c0_104, %c0_105] : memref<16x128xf32, #tpu.memory_space<vmem>>, vector<8x128xf32>
    %cst_106 = arith.constant 0.000000e+00 : f32
    %163 = vector.broadcast %cst_106 : f32 to vector<1x128xf32>
    %c0_107 = arith.constant 0 : index
    %c0_108 = arith.constant 0 : index
    %164 = vector.load %arg17[%c0_107, %c0_108] : memref<18x128xf32, #tpu.memory_space<vmem>>, vector<1x128xf32>
    tpu.vector_store %arg17[%c0_107, %c0_108], %163 {strides = array<i32>} : memref<18x128xf32, #tpu.memory_space<vmem>>, vector<1x128xf32>,
    %c9_109 = arith.constant 9 : index
    %c0_110 = arith.constant 0 : index
    %165 = vector.load %arg17[%c9_109, %c0_110] : memref<18x128xf32, #tpu.memory_space<vmem>>, vector<1x128xf32>
    tpu.vector_store %arg17[%c9_109, %c0_110], %163 {strides = array<i32>} : memref<18x128xf32, #tpu.memory_space<vmem>>, vector<1x128xf32>,
    %c1_111 = arith.constant 1 : index
    %c0_112 = arith.constant 0 : index
    %166 = vector.load %arg17[%c1_111, %c0_112] : memref<18x128xf32, #tpu.memory_space<vmem>>, vector<8x128xf32>
    tpu.vector_store %arg17[%c1_111, %c0_112], %162 {strides = array<i32>} : memref<18x128xf32, #tpu.memory_space<vmem>>, vector<8x128xf32>,
    %c0_113 = arith.constant 0 : index
    %c0_114 = arith.constant 0 : index
    %167 = vector.load %arg9[%c0_113, %c0_114] : memref<1x64xf32, #tpu.memory_space<vmem>>, vector<1x64xf32>
    %c0_115 = arith.constant 0 : index
    %c0_116 = arith.constant 0 : index
    %168 = vector.load %arg17[%c0_115, %c0_116] : memref<18x128xf32, #tpu.memory_space<vmem>>, vector<8x128xf32>
    %c0_117 = arith.constant 0 : index
    %c0_118 = arith.constant 0 : index
    %c0_119 = arith.constant 0 : index
    %169 = vector.load %arg8[%c0_117, %c0_118, %c0_119] : memref<3x128x64xf32, #tpu.memory_space<vmem>>, vector<1x128x64xf32>
    %170 = vector.shape_cast %169 : vector<1x128x64xf32> to vector<128x64xf32>
    %cst_120 = arith.constant dense<0.000000e+00> : vector<8x64xf32>
    %171 = tpu.matmul %168, %170, %cst_120 {dimension_numbers = #tpu.dot_dimension_numbers<[1], [0], [0], [1], [0, 0, 1, 1], [], []>} : vector<8x128xf32>, vector<128x64xf32>, vector<8x64xf32> -> vector<8x64xf32>
    %172 = vector.broadcast %167 : vector<1x64xf32> to vector<8x64xf32>
    %173 = arith.addf %172, %171 : vector<8x64xf32>
    %c1_121 = arith.constant 1 : index
    %c0_122 = arith.constant 0 : index
    %174 = vector.load %arg17[%c1_121, %c0_122] : memref<18x128xf32, #tpu.memory_space<vmem>>, vector<8x128xf32>
    %c1_123 = arith.constant 1 : index
    %c0_124 = arith.constant 0 : index
    %c0_125 = arith.constant 0 : index
    %175 = vector.load %arg8[%c1_123, %c0_124, %c0_125] : memref<3x128x64xf32, #tpu.memory_space<vmem>>, vector<1x128x64xf32>
    %176 = vector.shape_cast %175 : vector<1x128x64xf32> to vector<128x64xf32>
    %cst_126 = arith.constant dense<0.000000e+00> : vector<8x64xf32>
    %177 = tpu.matmul %174, %176, %cst_126 {dimension_numbers = #tpu.dot_dimension_numbers<[1], [0], [0], [1], [0, 0, 1, 1], [], []>} : vector<8x128xf32>, vector<128x64xf32>, vector<8x64xf32> -> vector<8x64xf32>
    %178 = arith.addf %173, %177 : vector<8x64xf32>
    %c2_127 = arith.constant 2 : index
    %c0_128 = arith.constant 0 : index
    %179 = vector.load %arg17[%c2_127, %c0_128] : memref<18x128xf32, #tpu.memory_space<vmem>>, vector<8x128xf32>
    %c2_129 = arith.constant 2 : index
    %c0_130 = arith.constant 0 : index
    %c0_131 = arith.constant 0 : index
    %180 = vector.load %arg8[%c2_129, %c0_130, %c0_131] : memref<3x128x64xf32, #tpu.memory_space<vmem>>, vector<1x128x64xf32>
    %181 = vector.shape_cast %180 : vector<1x128x64xf32> to vector<128x64xf32>
    %cst_132 = arith.constant dense<0.000000e+00> : vector<8x64xf32>
    %182 = tpu.matmul %179, %181, %cst_132 {dimension_numbers = #tpu.dot_dimension_numbers<[1], [0], [0], [1], [0, 0, 1, 1], [], []>} : vector<8x128xf32>, vector<128x64xf32>, vector<8x64xf32> -> vector<8x64xf32>
    %183 = arith.addf %178, %182 : vector<8x64xf32>
    %c0_133 = arith.constant 0 : index
    %c0_134 = arith.constant 0 : index
    %c0_135 = arith.constant 0 : index
    %184 = vector.load %arg10[%c0_133, %c0_134, %c0_135] : memref<2x64x128xf32, #tpu.memory_space<vmem>>, vector<1x64x128xf32>
    %185 = vector.shape_cast %184 : vector<1x64x128xf32> to vector<64x128xf32>
    %cst_136 = arith.constant dense<0.000000e+00> : vector<8x128xf32>
    %186 = tpu.matmul %183, %185, %cst_136 {dimension_numbers = #tpu.dot_dimension_numbers<[1], [0], [0], [1], [0, 0, 1, 1], [], []>} : vector<8x64xf32>, vector<64x128xf32>, vector<8x128xf32> -> vector<8x128xf32>
    %c0_137 = arith.constant 0 : index
    %c0_138 = arith.constant 0 : index
    %187 = vector.load %arg11[%c0_137, %c0_138] : memref<1x128xf32, #tpu.memory_space<vmem>>, vector<1x128xf32>
    %188 = vector.broadcast %187 : vector<1x128xf32> to vector<8x128xf32>
    %189 = arith.addf %186, %188 : vector<8x128xf32>
    %c1_139 = arith.constant 1 : index
    %c0_140 = arith.constant 0 : index
    %c0_141 = arith.constant 0 : index
    %190 = vector.load %arg10[%c1_139, %c0_140, %c0_141] : memref<2x64x128xf32, #tpu.memory_space<vmem>>, vector<1x64x128xf32>
    %191 = vector.shape_cast %190 : vector<1x64x128xf32> to vector<64x128xf32>
    %cst_142 = arith.constant dense<0.000000e+00> : vector<8x128xf32>
    %192 = tpu.matmul %183, %191, %cst_142 {dimension_numbers = #tpu.dot_dimension_numbers<[1], [0], [0], [1], [0, 0, 1, 1], [], []>} : vector<8x64xf32>, vector<64x128xf32>, vector<8x128xf32> -> vector<8x128xf32>
    %c0_143 = arith.constant 0 : index
    %c0_144 = arith.constant 0 : index
    %193 = vector.load %arg11[%c0_143, %c0_144] : memref<1x128xf32, #tpu.memory_space<vmem>>, vector<1x128xf32>
    %194 = vector.broadcast %193 : vector<1x128xf32> to vector<8x128xf32>
    %195 = arith.addf %192, %194 : vector<8x128xf32>
    %196 = vector.extract_strided_slice %189 {offsets = [0, 0], sizes = [1, 128], strides = [1, 1]} : vector<8x128xf32> to vector<1x128xf32>
    %c0_145 = arith.constant 0 : index
    %c0_146 = arith.constant 0 : index
    %197 = vector.load %arg18[%c0_145, %c0_146] : memref<16x128xf32, #tpu.memory_space<vmem>>, vector<1x128xf32>
    tpu.vector_store %arg18[%c0_145, %c0_146], %196 {strides = array<i32>} : memref<16x128xf32, #tpu.memory_space<vmem>>, vector<1x128xf32>,
    %198 = vector.extract_strided_slice %195 {offsets = [0, 0], sizes = [1, 128], strides = [1, 1]} : vector<8x128xf32> to vector<1x128xf32>
    %c1_147 = arith.constant 1 : index
    %c0_148 = arith.constant 0 : index
    %199 = vector.load %arg18[%c1_147, %c0_148] : memref<16x128xf32, #tpu.memory_space<vmem>>, vector<1x128xf32>
    tpu.vector_store %arg18[%c1_147, %c0_148], %198 {strides = array<i32>} : memref<16x128xf32, #tpu.memory_space<vmem>>, vector<1x128xf32>,
    %200 = vector.extract_strided_slice %189 {offsets = [1, 0], sizes = [1, 128], strides = [1, 1]} : vector<8x128xf32> to vector<1x128xf32>
    %c2_149 = arith.constant 2 : index
    %c0_150 = arith.constant 0 : index
    %201 = vector.load %arg18[%c2_149, %c0_150] : memref<16x128xf32, #tpu.memory_space<vmem>>, vector<1x128xf32>
    tpu.vector_store %arg18[%c2_149, %c0_150], %200 {strides = array<i32>} : memref<16x128xf32, #tpu.memory_space<vmem>>, vector<1x128xf32>,
    %202 = vector.extract_strided_slice %195 {offsets = [1, 0], sizes = [1, 128], strides = [1, 1]} : vector<8x128xf32> to vector<1x128xf32>
    %c3_151 = arith.constant 3 : index
    %c0_152 = arith.constant 0 : index
    %203 = vector.load %arg18[%c3_151, %c0_152] : memref<16x128xf32, #tpu.memory_space<vmem>>, vector<1x128xf32>
    tpu.vector_store %arg18[%c3_151, %c0_152], %202 {strides = array<i32>} : memref<16x128xf32, #tpu.memory_space<vmem>>, vector<1x128xf32>,
    %204 = vector.extract_strided_slice %189 {offsets = [2, 0], sizes = [1, 128], strides = [1, 1]} : vector<8x128xf32> to vector<1x128xf32>
    %c4_153 = arith.constant 4 : index
    %c0_154 = arith.constant 0 : index
    %205 = vector.load %arg18[%c4_153, %c0_154] : memref<16x128xf32, #tpu.memory_space<vmem>>, vector<1x128xf32>
    tpu.vector_store %arg18[%c4_153, %c0_154], %204 {strides = array<i32>} : memref<16x128xf32, #tpu.memory_space<vmem>>, vector<1x128xf32>,
    %206 = vector.extract_strided_slice %195 {offsets = [2, 0], sizes = [1, 128], strides = [1, 1]} : vector<8x128xf32> to vector<1x128xf32>
    %c5_155 = arith.constant 5 : index
    %c0_156 = arith.constant 0 : index
    %207 = vector.load %arg18[%c5_155, %c0_156] : memref<16x128xf32, #tpu.memory_space<vmem>>, vector<1x128xf32>
    tpu.vector_store %arg18[%c5_155, %c0_156], %206 {strides = array<i32>} : memref<16x128xf32, #tpu.memory_space<vmem>>, vector<1x128xf32>,
    %208 = vector.extract_strided_slice %189 {offsets = [3, 0], sizes = [1, 128], strides = [1, 1]} : vector<8x128xf32> to vector<1x128xf32>
    %c6_157 = arith.constant 6 : index
    %c0_158 = arith.constant 0 : index
    %209 = vector.load %arg18[%c6_157, %c0_158] : memref<16x128xf32, #tpu.memory_space<vmem>>, vector<1x128xf32>
    tpu.vector_store %arg18[%c6_157, %c0_158], %208 {strides = array<i32>} : memref<16x128xf32, #tpu.memory_space<vmem>>, vector<1x128xf32>,
    %210 = vector.extract_strided_slice %195 {offsets = [3, 0], sizes = [1, 128], strides = [1, 1]} : vector<8x128xf32> to vector<1x128xf32>
    %c7_159 = arith.constant 7 : index
    %c0_160 = arith.constant 0 : index
    %211 = vector.load %arg18[%c7_159, %c0_160] : memref<16x128xf32, #tpu.memory_space<vmem>>, vector<1x128xf32>
    tpu.vector_store %arg18[%c7_159, %c0_160], %210 {strides = array<i32>} : memref<16x128xf32, #tpu.memory_space<vmem>>, vector<1x128xf32>,
    %212 = vector.extract_strided_slice %189 {offsets = [4, 0], sizes = [1, 128], strides = [1, 1]} : vector<8x128xf32> to vector<1x128xf32>
    %c8 = arith.constant 8 : index
    %c0_161 = arith.constant 0 : index
    %213 = vector.load %arg18[%c8, %c0_161] : memref<16x128xf32, #tpu.memory_space<vmem>>, vector<1x128xf32>
    tpu.vector_store %arg18[%c8, %c0_161], %212 {strides = array<i32>} : memref<16x128xf32, #tpu.memory_space<vmem>>, vector<1x128xf32>,
    %214 = vector.extract_strided_slice %195 {offsets = [4, 0], sizes = [1, 128], strides = [1, 1]} : vector<8x128xf32> to vector<1x128xf32>
    %c9_162 = arith.constant 9 : index
    %c0_163 = arith.constant 0 : index
    %215 = vector.load %arg18[%c9_162, %c0_163] : memref<16x128xf32, #tpu.memory_space<vmem>>, vector<1x128xf32>
    tpu.vector_store %arg18[%c9_162, %c0_163], %214 {strides = array<i32>} : memref<16x128xf32, #tpu.memory_space<vmem>>, vector<1x128xf32>,
    %216 = vector.extract_strided_slice %189 {offsets = [5, 0], sizes = [1, 128], strides = [1, 1]} : vector<8x128xf32> to vector<1x128xf32>
    %c10 = arith.constant 10 : index
    %c0_164 = arith.constant 0 : index
    %217 = vector.load %arg18[%c10, %c0_164] : memref<16x128xf32, #tpu.memory_space<vmem>>, vector<1x128xf32>
    tpu.vector_store %arg18[%c10, %c0_164], %216 {strides = array<i32>} : memref<16x128xf32, #tpu.memory_space<vmem>>, vector<1x128xf32>,
    %218 = vector.extract_strided_slice %195 {offsets = [5, 0], sizes = [1, 128], strides = [1, 1]} : vector<8x128xf32> to vector<1x128xf32>
    %c11 = arith.constant 11 : index
    %c0_165 = arith.constant 0 : index
    %219 = vector.load %arg18[%c11, %c0_165] : memref<16x128xf32, #tpu.memory_space<vmem>>, vector<1x128xf32>
    tpu.vector_store %arg18[%c11, %c0_165], %218 {strides = array<i32>} : memref<16x128xf32, #tpu.memory_space<vmem>>, vector<1x128xf32>,
    %220 = vector.extract_strided_slice %189 {offsets = [6, 0], sizes = [1, 128], strides = [1, 1]} : vector<8x128xf32> to vector<1x128xf32>
    %c12 = arith.constant 12 : index
    %c0_166 = arith.constant 0 : index
    %221 = vector.load %arg18[%c12, %c0_166] : memref<16x128xf32, #tpu.memory_space<vmem>>, vector<1x128xf32>
    tpu.vector_store %arg18[%c12, %c0_166], %220 {strides = array<i32>} : memref<16x128xf32, #tpu.memory_space<vmem>>, vector<1x128xf32>,
    %222 = vector.extract_strided_slice %195 {offsets = [6, 0], sizes = [1, 128], strides = [1, 1]} : vector<8x128xf32> to vector<1x128xf32>
    %c13 = arith.constant 13 : index
    %c0_167 = arith.constant 0 : index
    %223 = vector.load %arg18[%c13, %c0_167] : memref<16x128xf32, #tpu.memory_space<vmem>>, vector<1x128xf32>
    tpu.vector_store %arg18[%c13, %c0_167], %222 {strides = array<i32>} : memref<16x128xf32, #tpu.memory_space<vmem>>, vector<1x128xf32>,
    %224 = vector.extract_strided_slice %189 {offsets = [7, 0], sizes = [1, 128], strides = [1, 1]} : vector<8x128xf32> to vector<1x128xf32>
    %c14 = arith.constant 14 : index
    %c0_168 = arith.constant 0 : index
    %225 = vector.load %arg18[%c14, %c0_168] : memref<16x128xf32, #tpu.memory_space<vmem>>, vector<1x128xf32>
    tpu.vector_store %arg18[%c14, %c0_168], %224 {strides = array<i32>} : memref<16x128xf32, #tpu.memory_space<vmem>>, vector<1x128xf32>,
    %226 = vector.extract_strided_slice %195 {offsets = [7, 0], sizes = [1, 128], strides = [1, 1]} : vector<8x128xf32> to vector<1x128xf32>
    %c15 = arith.constant 15 : index
    %c0_169 = arith.constant 0 : index
    %227 = vector.load %arg18[%c15, %c0_169] : memref<16x128xf32, #tpu.memory_space<vmem>>, vector<1x128xf32>
    tpu.vector_store %arg18[%c15, %c0_169], %226 {strides = array<i32>} : memref<16x128xf32, #tpu.memory_space<vmem>>, vector<1x128xf32>,
    %c0_170 = arith.constant 0 : index
    %c0_171 = arith.constant 0 : index
    %228 = vector.load %arg18[%c0_170, %c0_171] : memref<16x128xf32, #tpu.memory_space<vmem>>, vector<16x128xf32>
    %cst_172 = arith.constant 0.000000e+00 : f32
    %229 = vector.broadcast %cst_172 : f32 to vector<1x128xf32>
    %c0_173 = arith.constant 0 : index
    %c0_174 = arith.constant 0 : index
    %230 = vector.load %arg17[%c0_173, %c0_174] : memref<18x128xf32, #tpu.memory_space<vmem>>, vector<1x128xf32>
    tpu.vector_store %arg17[%c0_173, %c0_174], %229 {strides = array<i32>} : memref<18x128xf32, #tpu.memory_space<vmem>>, vector<1x128xf32>,
    %c17_175 = arith.constant 17 : index
    %c0_176 = arith.constant 0 : index
    %231 = vector.load %arg17[%c17_175, %c0_176] : memref<18x128xf32, #tpu.memory_space<vmem>>, vector<1x128xf32>
    tpu.vector_store %arg17[%c17_175, %c0_176], %229 {strides = array<i32>} : memref<18x128xf32, #tpu.memory_space<vmem>>, vector<1x128xf32>,
    %c1_177 = arith.constant 1 : index
    %c0_178 = arith.constant 0 : index
    %232 = vector.load %arg17[%c1_177, %c0_178] : memref<18x128xf32, #tpu.memory_space<vmem>>, vector<16x128xf32>
    tpu.vector_store %arg17[%c1_177, %c0_178], %228 {strides = array<i32>} : memref<18x128xf32, #tpu.memory_space<vmem>>, vector<16x128xf32>,
    %c0_179 = arith.constant 0 : index
    %c0_180 = arith.constant 0 : index
    %233 = vector.load %arg13[%c0_179, %c0_180] : memref<1x64xf32, #tpu.memory_space<vmem>>, vector<1x64xf32>
    %c0_181 = arith.constant 0 : index
    %c0_182 = arith.constant 0 : index
    %234 = vector.load %arg17[%c0_181, %c0_182] : memref<18x128xf32, #tpu.memory_space<vmem>>, vector<16x128xf32>
    %c0_183 = arith.constant 0 : index
    %c0_184 = arith.constant 0 : index
    %c0_185 = arith.constant 0 : index
    %235 = vector.load %arg12[%c0_183, %c0_184, %c0_185] : memref<3x128x64xf32, #tpu.memory_space<vmem>>, vector<1x128x64xf32>
    %236 = vector.shape_cast %235 : vector<1x128x64xf32> to vector<128x64xf32>
    %cst_186 = arith.constant dense<0.000000e+00> : vector<16x64xf32>
    %237 = tpu.matmul %234, %236, %cst_186 {dimension_numbers = #tpu.dot_dimension_numbers<[1], [0], [0], [1], [0, 0, 1, 1], [], []>} : vector<16x128xf32>, vector<128x64xf32>, vector<16x64xf32> -> vector<16x64xf32>
    %238 = vector.broadcast %233 : vector<1x64xf32> to vector<16x64xf32>
    %239 = arith.addf %238, %237 : vector<16x64xf32>
    %c1_187 = arith.constant 1 : index
    %c0_188 = arith.constant 0 : index
    %240 = vector.load %arg17[%c1_187, %c0_188] : memref<18x128xf32, #tpu.memory_space<vmem>>, vector<16x128xf32>
    %c1_189 = arith.constant 1 : index
    %c0_190 = arith.constant 0 : index
    %c0_191 = arith.constant 0 : index
    %241 = vector.load %arg12[%c1_189, %c0_190, %c0_191] : memref<3x128x64xf32, #tpu.memory_space<vmem>>, vector<1x128x64xf32>
    %242 = vector.shape_cast %241 : vector<1x128x64xf32> to vector<128x64xf32>
    %cst_192 = arith.constant dense<0.000000e+00> : vector<16x64xf32>
    %243 = tpu.matmul %240, %242, %cst_192 {dimension_numbers = #tpu.dot_dimension_numbers<[1], [0], [0], [1], [0, 0, 1, 1], [], []>} : vector<16x128xf32>, vector<128x64xf32>, vector<16x64xf32> -> vector<16x64xf32>
    %244 = arith.addf %239, %243 : vector<16x64xf32>
    %c2_193 = arith.constant 2 : index
    %c0_194 = arith.constant 0 : index
    %245 = vector.load %arg17[%c2_193, %c0_194] : memref<18x128xf32, #tpu.memory_space<vmem>>, vector<16x128xf32>
    %c2_195 = arith.constant 2 : index
    %c0_196 = arith.constant 0 : index
    %c0_197 = arith.constant 0 : index
    %246 = vector.load %arg12[%c2_195, %c0_196, %c0_197] : memref<3x128x64xf32, #tpu.memory_space<vmem>>, vector<1x128x64xf32>
    %247 = vector.shape_cast %246 : vector<1x128x64xf32> to vector<128x64xf32>
    %cst_198 = arith.constant dense<0.000000e+00> : vector<16x64xf32>
    %248 = tpu.matmul %245, %247, %cst_198 {dimension_numbers = #tpu.dot_dimension_numbers<[1], [0], [0], [1], [0, 0, 1, 1], [], []>} : vector<16x128xf32>, vector<128x64xf32>, vector<16x64xf32> -> vector<16x64xf32>
    %249 = arith.addf %244, %248 : vector<16x64xf32>
    %cst_199 = arith.constant 0.000000e+00 : f32
    %250 = vector.broadcast %cst_199 : f32 to vector<1x64xf32>
    %c0_200 = arith.constant 0 : index
    %c0_201 = arith.constant 0 : index
    %251 = vector.load %arg17[%c0_200, %c0_201] : memref<18x128xf32, #tpu.memory_space<vmem>>, vector<1x64xf32>
    tpu.vector_store %arg17[%c0_200, %c0_201], %250 {strides = array<i32>} : memref<18x128xf32, #tpu.memory_space<vmem>>, vector<1x64xf32>,
    %c17_202 = arith.constant 17 : index
    %c0_203 = arith.constant 0 : index
    %252 = vector.load %arg17[%c17_202, %c0_203] : memref<18x128xf32, #tpu.memory_space<vmem>>, vector<1x64xf32>
    tpu.vector_store %arg17[%c17_202, %c0_203], %250 {strides = array<i32>} : memref<18x128xf32, #tpu.memory_space<vmem>>, vector<1x64xf32>,
    %c1_204 = arith.constant 1 : index
    %c0_205 = arith.constant 0 : index
    %253 = vector.load %arg17[%c1_204, %c0_205] : memref<18x128xf32, #tpu.memory_space<vmem>>, vector<16x64xf32>
    tpu.vector_store %arg17[%c1_204, %c0_205], %249 {strides = array<i32>} : memref<18x128xf32, #tpu.memory_space<vmem>>, vector<16x64xf32>,
    %c0_206 = arith.constant 0 : index
    %c0_207 = arith.constant 0 : index
    %254 = vector.load %arg15[%c0_206, %c0_207] : memref<1x48xf32, #tpu.memory_space<vmem>>, vector<1x48xf32>
    %c0_208 = arith.constant 0 : index
    %c0_209 = arith.constant 0 : index
    %255 = vector.load %arg17[%c0_208, %c0_209] : memref<18x128xf32, #tpu.memory_space<vmem>>, vector<16x64xf32>
    %c0_210 = arith.constant 0 : index
    %c0_211 = arith.constant 0 : index
    %c0_212 = arith.constant 0 : index
    %256 = vector.load %arg14[%c0_210, %c0_211, %c0_212] : memref<3x64x48xf32, #tpu.memory_space<vmem>>, vector<1x64x48xf32>
    %257 = vector.shape_cast %256 : vector<1x64x48xf32> to vector<64x48xf32>
    %cst_213 = arith.constant dense<0.000000e+00> : vector<16x48xf32>
    %258 = tpu.matmul %255, %257, %cst_213 {dimension_numbers = #tpu.dot_dimension_numbers<[1], [0], [0], [1], [0, 0, 1, 1], [], []>} : vector<16x64xf32>, vector<64x48xf32>, vector<16x48xf32> -> vector<16x48xf32>
    %259 = vector.broadcast %254 : vector<1x48xf32> to vector<16x48xf32>
    %260 = arith.addf %259, %258 : vector<16x48xf32>
    %c1_214 = arith.constant 1 : index
    %c0_215 = arith.constant 0 : index
    %261 = vector.load %arg17[%c1_214, %c0_215] : memref<18x128xf32, #tpu.memory_space<vmem>>, vector<16x64xf32>
    %c1_216 = arith.constant 1 : index
    %c0_217 = arith.constant 0 : index
    %c0_218 = arith.constant 0 : index
    %262 = vector.load %arg14[%c1_216, %c0_217, %c0_218] : memref<3x64x48xf32, #tpu.memory_space<vmem>>, vector<1x64x48xf32>
    %263 = vector.shape_cast %262 : vector<1x64x48xf32> to vector<64x48xf32>
    %cst_219 = arith.constant dense<0.000000e+00> : vector<16x48xf32>
    %264 = tpu.matmul %261, %263, %cst_219 {dimension_numbers = #tpu.dot_dimension_numbers<[1], [0], [0], [1], [0, 0, 1, 1], [], []>} : vector<16x64xf32>, vector<64x48xf32>, vector<16x48xf32> -> vector<16x48xf32>
    %265 = arith.addf %260, %264 : vector<16x48xf32>
    %c2_220 = arith.constant 2 : index
    %c0_221 = arith.constant 0 : index
    %266 = vector.load %arg17[%c2_220, %c0_221] : memref<18x128xf32, #tpu.memory_space<vmem>>, vector<16x64xf32>
    %c2_222 = arith.constant 2 : index
    %c0_223 = arith.constant 0 : index
    %c0_224 = arith.constant 0 : index
    %267 = vector.load %arg14[%c2_222, %c0_223, %c0_224] : memref<3x64x48xf32, #tpu.memory_space<vmem>>, vector<1x64x48xf32>
    %268 = vector.shape_cast %267 : vector<1x64x48xf32> to vector<64x48xf32>
    %cst_225 = arith.constant dense<0.000000e+00> : vector<16x48xf32>
    %269 = tpu.matmul %266, %268, %cst_225 {dimension_numbers = #tpu.dot_dimension_numbers<[1], [0], [0], [1], [0, 0, 1, 1], [], []>} : vector<16x64xf32>, vector<64x48xf32>, vector<16x48xf32> -> vector<16x48xf32>
    %270 = arith.addf %265, %269 : vector<16x48xf32>
    %c0_226 = arith.constant 0 : index
    %c0_227 = arith.constant 0 : index
    %c0_228 = arith.constant 0 : index
    %271 = vector.load %arg16[%c0_226, %c0_227, %c0_228] : memref<1x16x48xf32, #tpu.memory_space<vmem>>, vector<1x16x48xf32>
    %272 = vector.shape_cast %271 : vector<1x16x48xf32> to vector<16x48xf32>
    %273 = vector.shape_cast %270 : vector<16x48xf32> to vector<1x16x48xf32>
    tpu.vector_store %arg16[%c0_226, %c0_227, %c0_228], %273 {strides = array<i32>} : memref<1x16x48xf32, #tpu.memory_space<vmem>>, vector<1x16x48xf32>,
    return
  }
  func.func @transform_0(%arg0: i32) -> (i32, i32, i32) {
    %c0_i32 = arith.constant 0 : i32
    %c0_i32_0 = arith.constant 0 : i32
    %c0_i32_1 = arith.constant 0 : i32
    return %arg0, %c0_i32, %c0_i32_0 : i32, i32, i32
  }
  func.func @transform_1(%arg0: i32) -> (i32, i32, i32) {
    %c0_i32 = arith.constant 0 : i32
    %c0_i32_0 = arith.constant 0 : i32
    %c0_i32_1 = arith.constant 0 : i32
    %c0_i32_2 = arith.constant 0 : i32
    return %c0_i32, %c0_i32_0, %c0_i32_1 : i32, i32, i32
  }
  func.func @transform_2(%arg0: i32) -> (i32, i32) {
    %c0_i32 = arith.constant 0 : i32
    %c0_i32_0 = arith.constant 0 : i32
    %c0_i32_1 = arith.constant 0 : i32
    return %c0_i32, %c0_i32_0 : i32, i32
  }
  func.func @transform_3(%arg0: i32) -> (i32, i32, i32) {
    %c0_i32 = arith.constant 0 : i32
    %c0_i32_0 = arith.constant 0 : i32
    %c0_i32_1 = arith.constant 0 : i32
    %c0_i32_2 = arith.constant 0 : i32
    return %c0_i32, %c0_i32_0, %c0_i32_1 : i32, i32, i32
  }
  func.func @transform_4(%arg0: i32) -> (i32, i32) {
    %c0_i32 = arith.constant 0 : i32
    %c0_i32_0 = arith.constant 0 : i32
    %c0_i32_1 = arith.constant 0 : i32
    return %c0_i32, %c0_i32_0 : i32, i32
  }
  func.func @transform_5(%arg0: i32) -> (i32, i32, i32) {
    %c0_i32 = arith.constant 0 : i32
    %c0_i32_0 = arith.constant 0 : i32
    %c0_i32_1 = arith.constant 0 : i32
    %c0_i32_2 = arith.constant 0 : i32
    return %c0_i32, %c0_i32_0, %c0_i32_1 : i32, i32, i32
  }
  func.func @transform_6(%arg0: i32) -> (i32, i32) {
    %c0_i32 = arith.constant 0 : i32
    %c0_i32_0 = arith.constant 0 : i32
    %c0_i32_1 = arith.constant 0 : i32
    return %c0_i32, %c0_i32_0 : i32, i32
  }
  func.func @transform_7(%arg0: i32) -> (i32, i32, i32) {
    %c0_i32 = arith.constant 0 : i32
    %c0_i32_0 = arith.constant 0 : i32
    %c0_i32_1 = arith.constant 0 : i32
    %c0_i32_2 = arith.constant 0 : i32
    return %c0_i32, %c0_i32_0, %c0_i32_1 : i32, i32, i32
  }
  func.func @transform_8(%arg0: i32) -> (i32, i32) {
    %c0_i32 = arith.constant 0 : i32
    %c0_i32_0 = arith.constant 0 : i32
    %c0_i32_1 = arith.constant 0 : i32
    return %c0_i32, %c0_i32_0 : i32, i32
  }
  func.func @transform_9(%arg0: i32) -> (i32, i32, i32) {
    %c0_i32 = arith.constant 0 : i32
    %c0_i32_0 = arith.constant 0 : i32
    %c0_i32_1 = arith.constant 0 : i32
    %c0_i32_2 = arith.constant 0 : i32
    return %c0_i32, %c0_i32_0, %c0_i32_1 : i32, i32, i32
  }
  func.func @transform_10(%arg0: i32) -> (i32, i32) {
    %c0_i32 = arith.constant 0 : i32
    %c0_i32_0 = arith.constant 0 : i32
    %c0_i32_1 = arith.constant 0 : i32
    return %c0_i32, %c0_i32_0 : i32, i32
  }
  func.func @transform_11(%arg0: i32) -> (i32, i32, i32) {
    %c0_i32 = arith.constant 0 : i32
    %c0_i32_0 = arith.constant 0 : i32
    %c0_i32_1 = arith.constant 0 : i32
    %c0_i32_2 = arith.constant 0 : i32
    return %c0_i32, %c0_i32_0, %c0_i32_1 : i32, i32, i32
  }
  func.func @transform_12(%arg0: i32) -> (i32, i32) {
    %c0_i32 = arith.constant 0 : i32
    %c0_i32_0 = arith.constant 0 : i32
    %c0_i32_1 = arith.constant 0 : i32
    return %c0_i32, %c0_i32_0 : i32, i32
  }
  func.func @transform_13(%arg0: i32) -> (i32, i32, i32) {
    %c0_i32 = arith.constant 0 : i32
    %c0_i32_0 = arith.constant 0 : i32
    %c0_i32_1 = arith.constant 0 : i32
    %c0_i32_2 = arith.constant 0 : i32
    return %c0_i32, %c0_i32_0, %c0_i32_1 : i32, i32, i32
  }
  func.func @transform_14(%arg0: i32) -> (i32, i32) {
    %c0_i32 = arith.constant 0 : i32
    %c0_i32_0 = arith.constant 0 : i32
    %c0_i32_1 = arith.constant 0 : i32
    return %c0_i32, %c0_i32_0 : i32, i32
  }
  func.func @transform_15(%arg0: i32) -> (i32, i32, i32) {
    %c0_i32 = arith.constant 0 : i32
    %c0_i32_0 = arith.constant 0 : i32
    %c0_i32_1 = arith.constant 0 : i32
    return %arg0, %c0_i32, %c0_i32_0 : i32, i32, i32
  }
}

</mosaic_0001>

<bundles_post_ra>
// kernel: unet_forward.1
= control target key start
LH: loop header
LB: loop body
LE: loop exit
PB: predicated region body
PF: predicated region fallthrough
CT: control target
= control target key end

     0   :  { %s3922_s18 = smov 0   ;;  %s4804_s0 = inlined_call_operand.vmem [shape: f32[2,16,64], index: 0, kind: input, shape index: {}]   ;;  %s4805_s1 = inlined_call_operand.vmem [shape: f32[3,64,128], index: 1, kind: input, shape index: {}]   ;;  %s4806_s2 = inlined_call_operand.vmem [shape: f32[1,128], index: 2, kind: input, shape index: {}]   ;;  %s4807_s3 = inlined_call_operand.vmem [shape: f32[3,120,128], index: 3, kind: input, shape index: {}]   ;;  %s4808_s4 = inlined_call_operand.vmem [shape: f32[1,128], index: 4, kind: input, shape index: {}]   ;;  %s4809_s5 = inlined_call_operand.vmem [shape: f32[2,112,128], index: 5, kind: input, shape index: {}]   ;;  %s4810_s6 = inlined_call_operand.vmem [shape: f32[1,128], index: 6, kind: input, shape index: {}]   ;;  %s4811_s7 = inlined_call_operand.vmem [shape: f32[3,128,64], index: 7, kind: input, shape index: {}]   ;;  %s4812_s8 = inlined_call_operand.vmem [shape: f32[1,64], index: 8, kind: input, shape index: {}]   ;;  %s4813_s9 = inlined_call_operand.vmem [shape: f32[2,64,128], index: 9, kind: input, shape index: {}]   ;;  %s4814_s10 = inlined_call_operand.vmem [shape: f32[1,128], index: 10, kind: input, shape index: {}]   ;;  %s4815_s11 = inlined_call_operand.vmem [shape: f32[3,128,64], index: 11, kind: input, shape index: {}]   ;;  %s4816_s12 = inlined_call_operand.vmem [shape: f32[1,64], index: 12, kind: input, shape index: {}]   ;;  %s4817_s13 = inlined_call_operand.vmem [shape: f32[3,64,48], index: 13, kind: input, shape index: {}]   ;;  %s4818_s14 = inlined_call_operand.vmem [shape: f32[1,48], index: 14, kind: input, shape index: {}]   ;;  %s4819_s15 = inlined_call_operand.vmem [shape: f32[2,16,48], index: 15, kind: output, shape index: {}]  }
   0x1 LB: > { %s2424_s19 = sadd.s32 4294967295, %s3835_s18   ;;  %p2428_p0 = scmp.ge.s32.totalorder %s3835_s18, 1  ;;  %s3835_s18 = sphi %s3922_s18, %s25_s18  }
   0x2   : > { %p437_p1 = scmp.lt.s32.totalorder %s3835_s18, 3 }
   0x4   : > { %p438_p2 = pnand %p2428_p0, %p437_p1 }
   0x5   : > { %v506_v0 = vld [vmem:[%s4805_s1] sm:$0xff] (!%p438_p2)  ;;  %v507_v1 = vld [vmem:[%s4805_s1 + $0x8] sm:$0xff] (!%p438_p2)  ;;  %v508_v2 = vld [vmem:[%s4805_s1 + $0x10] sm:$0xff] (!%p438_p2)  ;;  %p485_p3 = scmp.lt.s32.totalorder (!%p438_p2), %s2424_s19, 1  ;;  %vm497_vm0 = vcmask (!%p438_p2), 516096   ;;  %v3837_v5 = vmov (!%p438_p2), 0.0  }
   0x6   : > { %441 = sbr.rel (%p438_p2) target bundleno = 2148 (0x864), region = 80  ;;  %v3395_v3 = vpack.c.bf16 (!%p438_p2), %v507_v1, %v506_v0  ;;  %v509_v4 = vld [vmem:[%s4805_s1 + $0x18] sm:$0xff] (!%p438_p2)  ;;  %498 = vst.msk [vmem:[#allocation2] sm:$0x1] (!%p438_p2), %vm497_vm0, %v3837_v5  ;;  %499 = vst.msk [vmem:[#allocation2 + $0x11] sm:$0x1] (!%p438_p2), %vm497_vm0, %v3837_v5 }
   0x7   : > { %v3399_v6 = vpack.c.bf16 (!%p438_p2), %v509_v4, %v508_v2  ;;  %v510_v7 = vld [vmem:[%s4805_s1 + $0x20] sm:$0xff] (!%p438_p2)  ;;  %v511_v8 = vld [vmem:[%s4805_s1 + $0x28] sm:$0xff] (!%p438_p2)  ;;  %vm500_vm1 = vcmask (!%p438_p2), 523264   ;;  %v512_v10 = vld [vmem:[%s4805_s1 + $0x30] sm:$0xff] (!%p438_p2)  ;;  %vm802_vm2 = vcmask (!%p438_p2), 974848   ;;  %v3838_v48 = vmov (!%p438_p2), 0.0|0.0  }
   0x8   : > { %3396 = vmatprep.subr.bf16.mxu0 (!%p438_p2), %v3395_v3  ;;  %v3403_v9 = vpack.c.bf16 (!%p438_p2), %v511_v8, %v510_v7  ;;  %v513_v11 = vld [vmem:[%s4805_s1 + $0x38] sm:$0xff] (!%p438_p2)  ;;  %v2436_v15 = vld [vmem:[%s4805_s1 + $0x40] sm:$0xff] (!%p438_p2)  ;;  %v2437_v16 = vld [vmem:[%s4805_s1 + $0x48] sm:$0xff] (!%p438_p2)  ;;  %3443 = vmatprep.subr.bf16.mxu1 (!%p438_p2), %v3838_v48  ;;  %s3839_s25 = smov (!%p438_p2), 120   ;;  %vm3840_vm3 = vmmov (!%p438_p2), 0   ;;  %vm804_vm4 = vcmask (!%p438_p2), 976898  }
   0x9   : > { %3398 = vmatpush3.bf16.msra.mxu0 (!%p438_p2), %v3395_v3  ;;  %v3407_v14 = vpack.c.bf16 (!%p438_p2), %v513_v11, %v512_v10  ;;  %v3411_v17 = vpack.c.bf16 (!%p438_p2), %v2437_v16, %v2436_v15  ;;  %v2438_v19 = vld [vmem:[%s4805_s1 + $0x50] sm:$0xff] (!%p438_p2)  ;;  %v2439_v20 = vld [vmem:[%s4805_s1 + $0x58] sm:$0xff] (!%p438_p2)  ;;  %v2440_v25 = vld [vmem:[%s4805_s1 + $0x60] sm:$0xff] (!%p438_p2)  ;;  %2959 = vmatprep.mubr.msk.f32.mxu1 (!%p438_p2), %vm3840_vm3, %v3837_v5  ;;  %vm806_vm5 = vcmask (!%p438_p2), 978948   ;;  %vm808_vm6 = vcmask (!%p438_p2), 980998   ;;  %s3841_s26 = smov (!%p438_p2), 112  }
   0xa   : > { %3400 = vmatprep.subr.bf16.mxu0 (!%p438_p2), %v3399_v6  ;;  %v3415_v23 = vpack.c.bf16 (!%p438_p2), %v2439_v20, %v2438_v19  ;;  %v2441_v26 = vld [vmem:[%s4805_s1 + $0x68] sm:$0xff] (!%p438_p2)  ;;  %v2442_v28 = vld [vmem:[%s4805_s1 + $0x70] sm:$0xff] (!%p438_p2)  ;;  %v2443_v29 = vld [vmem:[%s4805_s1 + $0x78] sm:$0xff] (!%p438_p2)  ;;  %vm826_vm7 = vcmask (!%p438_p2), 982016   ;;  %vm1117_vm8 = vcmask (!%p438_p2), 909312   ;;  %vm1119_vm9 = vcmask (!%p438_p2), 911362  }
   0xb   : > { %v3419_v27 = vpack.c.bf16 (!%p438_p2), %v2441_v26, %v2440_v25  ;;  %v3423_v30 = vpack.c.bf16 (!%p438_p2), %v2443_v29, %v2442_v28  ;;  %v2446_v31 = vld [vmem:[%s4805_s1 + $0x80] sm:$0xff] (!%p438_p2)  ;;  %v2447_v32 = vld [vmem:[%s4805_s1 + $0x88] sm:$0xff] (!%p438_p2)  ;;  %v2448_v34 = vld [vmem:[%s4805_s1 + $0x90] sm:$0xff] (!%p438_p2)  ;;  %vm1121_vm10 = vcmask (!%p438_p2), 913412   ;;  %vm1123_vm11 = vcmask (!%p438_p2), 915462  }
   0xc   : > { %v3427_v33 = vpack.c.bf16 (!%p438_p2), %v2447_v32, %v2446_v31  ;;  %v2449_v35 = vld [vmem:[%s4805_s1 + $0x98] sm:$0xff] (!%p438_p2)  ;;  %v2450_v39 = vld [vmem:[%s4805_s1 + $0xa0] sm:$0xff] (!%p438_p2)  ;;  %v2451_v40 = vld [vmem:[%s4805_s1 + $0xa8] sm:$0xff] (!%p438_p2)  ;;  %vm1147_vm12 = vcmask (!%p438_p2), 916480   ;;  %vm2366_vm13 = vcmask (!%p438_p2), 392192  }
   0xd   : > { %s4821_s19 = smov (!%p485_p3, %s2424_s19), 1  ;;  %3402 = vmatpush3.bf16.msra.mxu0 %v3399_v6  ;;  %v3431_v37 = vpack.c.bf16 %v2449_v35, %v2448_v34  ;;  %v3435_v41 = vpack.c.bf16 %v2451_v40, %v2450_v39  ;;  %v2452_v42 = vld [vmem:[%s4805_s1 + $0xb0] sm:$0xff]  ;;  %v2453_v43 = vld [vmem:[%s4805_s1 + $0xb8] sm:$0xff]  ;;  %v830_v45 = vld [vmem:[%s4807_s3] sm:$0xff] }
   0xe   : > { %s2609_s17 = sshll.u32 %s4821_s19, 4  ;;  %3404 = vmatprep.subr.bf16.mxu0 %v3403_v9  ;;  %v3439_v44 = vpack.c.bf16 %v2453_v43, %v2452_v42  ;;  %v831_v46 = vld [vmem:[%s4807_s3 + $0x8] sm:$0xff]  ;;  %v832_v47 = vld [vmem:[%s4807_s3 + $0x10] sm:$0xff]  ;;  %v833_v50 = vld [vmem:[%s4807_s3 + $0x18] sm:$0xff] }
   0xf   : > { %s489_s24 = scalar_lea.vmem %s4804_s0, %s2609_s17  ;;  %v3444_v49 = vpack.c.bf16 %v831_v46, %v830_v45  ;;  %v3447_v51 = vpack.c.bf16 %v833_v50, %v832_v47  ;;  %v834_v52 = vld [vmem:[%s4807_s3 + $0x20] sm:$0xff]  ;;  %v835_v53 = vld [vmem:[%s4807_s3 + $0x28] sm:$0xff]  ;;  %v836_v56 = vld [vmem:[%s4807_s3 + $0x30] sm:$0xff]  ;;  %s494_s27 = scalar_lea.vmem %s4819_s15, %s2609_s17 }
  0x10   : > { %v495_v12 = vld [vmem:[%s489_s24] sm:$0xff]  ;;  %v496_v13 = vld [vmem:[%s489_s24 + $0x8] sm:$0xff]  ;;  %v3450_v54 = vpack.c.bf16 %v835_v53, %v834_v52  ;;  %v837_v57 = vld [vmem:[%s4807_s3 + $0x38] sm:$0xff] }
  0x11   : > { %501 = vst.msk [vmem:[#allocation2 + $0x1] sm:$0xff] %vm500_vm1, %v495_v12  ;;  %502 = vst.msk [vmem:[#allocation2 + $0x9] sm:$0xff] %vm500_vm1, %v496_v13  ;;  %3406 = vmatpush3.bf16.msra.mxu0 %v3403_v9  ;;  %3445 = vmatpush3.bf16.msra.mxu1 %v3444_v49  ;;  %v2435_v55 = vld [vmem:[%s4806_s2] ss:$0 sm:$0xff]  ;;  %v3453_v58 = vpack.c.bf16 %v837_v57, %v836_v56  ;;  %v839_v0 = vld [vmem:[%s4807_s3 + $0x48] sm:$0xff] }
  0x12   : > { %3408 = vmatprep.subr.bf16.mxu0 %v3407_v14  ;;  %3446 = vmatprep.subr.bf16.mxu1 %v3838_v48  ;;  %v838_v63 = vld [vmem:[%s4807_s3 + $0x40] sm:$0xff]  ;;  %v840_v6 = vld [vmem:[%s4807_s3 + $0x50] sm:$0xff]  ;;  %v841_v7 = vld [vmem:[%s4807_s3 + $0x58] sm:$0xff] }
  0x13   : > { %v3456_v1 = vpack.c.bf16 %v839_v0, %v838_v63  ;;  %v3459_v8 = vpack.c.bf16 %v841_v7, %v840_v6  ;;  %v842_v11 = vld [vmem:[%s4807_s3 + $0x60] sm:$0xff]  ;;  %v843_v12 = vld [vmem:[%s4807_s3 + $0x68] sm:$0xff]  ;;  %v844_v15 = vld [vmem:[%s4807_s3 + $0x70] sm:$0xff] }
  0x14   : > { %v3462_v13 = vpack.c.bf16 %v843_v12, %v842_v11  ;;  %v2461_v25 = vld [vmem:[%s4807_s3 + $0x90] sm:$0xff]  ;;  %v2462_v29 = vld [vmem:[%s4807_s3 + $0x98] sm:$0xff]  ;;  %v2464_v32 = vld [vmem:[%s4807_s3 + $0xa8] sm:$0xff] }
  0x15   : > { %3410 = vmatpush3.bf16.msra.mxu0 %v3407_v14  ;;  %3448 = vmatpush3.bf16.msra.mxu1 %v3447_v51  ;;  %v2466_v35 = vld [vmem:[%s4807_s3 + $0xb8] sm:$0xff]  ;;  %v2469_v39 = vld [vmem:[%s4807_s3 + $0xd0] sm:$0xff]  ;;  %v2471_v42 = vld [vmem:[%s4807_s3 + $0xe0] sm:$0xff] }
  0x16   : > { %3412 = vmatprep.subr.bf16.mxu0 %v3411_v17  ;;  %3449 = vmatprep.subr.bf16.mxu1 %v3838_v48  ;;  %v2475_v45 = vld [vmem:[%s4807_s3 + $0xf8] sm:$0xff]  ;;  %v2472_v46 = vld [vmem:[%s4807_s3 + $0xe8] sm:$0xff]  ;;  %v2476_v49 = vld [vmem:[%s4807_s3 + $0x100] sm:$0xff] }
  0x17   : > { %v2477_v50 = vld [vmem:[%s4807_s3 + $0x108] sm:$0xff]  ;;  %v2478_v53 = vld [vmem:[%s4807_s3 + $0x110] sm:$0xff]  ;;  %v2480_v56 = vld [vmem:[%s4807_s3 + $0x120] sm:$0xff] }
  0x18   : > { %v504_v18 = vld [vmem:[#allocation2] sm:$0xff]  ;;  %v698_v21 = vld [vmem:[#allocation2 + $0xa] sm:$0xff]  ;;  %v3489_v52 = vpack.c.bf16 %v2477_v50, %v2476_v49 }
  0x19   : > { %2888 = vmatprep.mubr.msk.f32.mxu0 %vm500_vm1, %v504_v18  ;;  %v505_v22 = vld [vmem:[#allocation2 + $0x8] sm:$0xff]  ;;  %1777 = vst [vmem:[#allocation2 + $0x11] sm:$0x1] %v3837_v5  ;;  %824 = vst.msk [vmem:[#allocation2] sm:$0x1] %vm802_vm2, %v3837_v5  ;;  %3451 = vmatpush3.bf16.msra.mxu1 %v3450_v54  ;;  %v2479_v54 = vld [vmem:[%s4807_s3 + $0x118] sm:$0xff] }
  0x1a   : > { %v603_v24 = vld [vmem:[#allocation2 + $0x1] sm:$0xff]  ;;  %2889 = vmatmul.mubr.msk.f32.vlgmr.msra.gmra.mrb[0].mxu0 %vm500_vm1, %v505_v22  ;;  %v604_v36 = vld [vmem:[#allocation2 + $0x9] sm:$0xff]  ;;  %3452 = vmatprep.subr.bf16.mxu1 %v3838_v48 }
  0x1b   : > { %3414 = vmatpush3.bf16.msra.mxu0 %v3411_v17  ;;  %2907 = vmatprep.mubr.msk.f32.mxu0 %vm500_vm1, %v603_v24  ;;  %v697_v38 = vld [vmem:[#allocation2 + $0x2] sm:$0xff]  ;;  %v2500_v50 = vld [vmem:[%s4809_s5 + $0xb0] sm:$0xff] }
  0x1c   : > { %3416 = vmatprep.subr.bf16.mxu0 %v3415_v23  ;;  %825 = vst.msk [vmem:[#allocation2 + $0x9] sm:$0x1] %vm802_vm2, %v3837_v5  ;;  %v2459_v22 = vld [vmem:[%s4807_s3 + $0x80] sm:$0xff]  ;;  %v2460_v24 = vld [vmem:[%s4807_s3 + $0x88] sm:$0xff] }
  0x1d   : > { %3454 = vmatpush3.bf16.msra.mxu1 %v3453_v58  ;;  %v3468_v28 = vpack.c.bf16 %v2461_v25, %v2460_v24  ;;  %v2481_v57 = vld [vmem:[%s4807_s3 + $0x128] sm:$0xff]  ;;  %v1126_v6 = vld [vmem:[%s4809_s5] sm:$0xff] }
  0x1e   : > { %3455 = vmatprep.subr.bf16.mxu1 %v3838_v48  ;;  %v3495_v58 = vpack.c.bf16 %v2481_v57, %v2480_v56  ;;  %v2485_v63 = vld [vmem:[%s4807_s3 + $0x148] sm:$0xff]  ;;  %v1130_v12 = vld [vmem:[%s4809_s5 + $0x20] sm:$0xff]  ;;  %v2504_v56 = vld [vmem:[%s4809_s5 + $0xd0] sm:$0xff] }
  0x1f   : > { %3418 = vmatpush3.bf16.msra.mxu0 %v3415_v23  ;;  %v1127_v7 = vld [vmem:[%s4809_s5 + $0x8] sm:$0xff]  ;;  %v2457_v24 = vld [vmem:[%s4808_s4] ss:$0 sm:$0xff]  ;;  %v2505_v57 = vld [vmem:[%s4809_s5 + $0xd8] sm:$0xff] }
  0x20   : > { %3420 = vmatprep.subr.bf16.mxu0 %v3419_v27  ;;  %v1138_v25 = vld [vmem:[%s4809_s5 + $0x60] sm:$0xff] }
  0x21   : > { %3457 = vmatpush3.bf16.msra.mxu1 %v3456_v1  ;;  %v2486_v1 = vld [vmem:[%s4807_s3 + $0x150] sm:$0xff] }
  0x22   : > { %3458 = vmatprep.subr.bf16.mxu1 %v3838_v48 }
  0x23   : > { %3422 = vmatpush3.bf16.msra.mxu0 %v3419_v27 }
  0x24   : > { %3424 = vmatprep.subr.bf16.mxu0 %v3423_v30 }
  0x25   : > { %3460 = vmatpush3.bf16.msra.mxu1 %v3459_v8  ;;  %v1128_v8 = vld [vmem:[%s4809_s5 + $0x10] sm:$0xff] }
  0x26   : > { %3461 = vmatprep.subr.bf16.mxu1 %v3838_v48 }
  0x27   : > { %3426 = vmatpush3.bf16.msra.mxu0 %v3423_v30  ;;  %v2463_v30 = vld [vmem:[%s4807_s3 + $0xa0] sm:$0xff] }
  0x28   : > { %3428 = vmatprep.subr.bf16.mxu0 %v3427_v33  ;;  %v3471_v31 = vpack.c.bf16 %v2463_v30, %v2462_v29 }
  0x29   : > { %3463 = vmatpush3.bf16.msra.mxu1 %v3462_v13  ;;  %v1131_v13 = vld [vmem:[%s4809_s5 + $0x28] sm:$0xff] }
  0x2a   : > { %2908 = vmatmul.mubr.msk.f32.vlgmr.msra.gmra.mrb[0].mxu0 %vm500_vm1, %v604_v36  ;;  %2957 = vmatprep.subr.mxu1 %v3837_v5  ;;  %v2467_v36 = vld [vmem:[%s4807_s3 + $0xc0] sm:$0xff] }
  0x2b   : > { %3430 = vmatpush3.bf16.msra.mxu0 %v3427_v33  ;;  %2926 = vmatprep.mubr.msk.f32.mxu0 %vm500_vm1, %v697_v38  ;;  %v2465_v33 = vld [vmem:[%s4807_s3 + $0xb0] sm:$0xff]  ;;  %v2468_v38 = vld [vmem:[%s4807_s3 + $0xc8] sm:$0xff] }
  0x2c   : > { %3432 = vmatprep.subr.bf16.mxu0 %v3431_v37  ;;  %v3474_v34 = vpack.c.bf16 %v2465_v33, %v2464_v32  ;;  %v3480_v40 = vpack.c.bf16 %v2469_v39, %v2468_v38  ;;  %v2494_v39 = vld [vmem:[%s4809_s5 + $0x80] sm:$0xff] }
  0x2d   : > { %2958 = vmatpush3.msra.mxu1 %v844_v15  ;;  %v1132_v15 = vld [vmem:[%s4809_s5 + $0x30] sm:$0xff] }
  0x2e   : > { %3464 = vmatprep.subr.bf16.mxu1 %v3838_v48 }
  0x2f   : > { %3434 = vmatpush3.bf16.msra.mxu0 %v3431_v37  ;;  %v3477_v37 = vpack.c.bf16 %v2467_v36, %v2466_v35  ;;  %v2492_v36 = vld [vmem:[%s4809_s5 + $0x70] sm:$0xff] }
  0x30   : > { %3436 = vmatprep.subr.bf16.mxu0 %v3435_v41 }
  0x33   : > { %3438 = vmatpush3.bf16.msra.mxu0 %v3435_v41  ;;  %v2470_v41 = vld [vmem:[%s4807_s3 + $0xd8] sm:$0xff] }
  0x34   : > { %3440 = vmatprep.subr.bf16.mxu0 %v3439_v44  ;;  %v3483_v43 = vpack.c.bf16 %v2471_v42, %v2470_v41 }
  0x37   : > { %3442 = vmatpush3.bf16.msra.mxu0 %v3439_v44  ;;  %v2474_v44 = vld [vmem:[%s4807_s3 + $0xf0] sm:$0xff] }
  0x38   : > { %3506 = vmatprep.subr.bf16.mxu0 %v3838_v48  ;;  %v3486_v47 = vpack.c.bf16 %v2475_v45, %v2474_v44  ;;  %v2497_v44 = vld [vmem:[%s4809_s5 + $0x98] sm:$0xff] }
  0x3a   : > { %2927 = vmatmul.mubr.msk.f32.vlgmr.msra.gmra.mrb[0].mxu0 %vm500_vm1, %v698_v21  ;;  %v2458_v21 = vld [vmem:[%s4807_s3 + $0x78] sm:$0xff] }
  0x3b   : > { %3056 = vmatprep.mubr.msk.f32.mxu0 %vm3840_vm3, %v3837_v5  ;;  %v3465_v23 = vpack.c.bf16 %v2459_v22, %v2458_v21  ;;  %v1136_v21 = vld [vmem:[%s4809_s5 + $0x50] sm:$0xff]  ;;  %v1137_v22 = vld [vmem:[%s4809_s5 + $0x58] sm:$0xff] }
 0x10d   : > { %v2928_v59 = vpop.f32.mrb[0].mxu0 }
 0x10e   : > { %v3788_v60 = vadd.f32 %v2928_v59, %v2435_v55  ;;  %v780_v61 = vpop.f32.mrb[1].mxu0  ;;  %v2482_v59 = vld [vmem:[%s4807_s3 + $0x130] sm:$0xff] }
 0x10f   : > { %v3789_v62 = vadd.f32 %v2435_v55, %v780_v61  ;;  %v3492_v55 = vpack.c.bf16 %v2479_v54, %v2478_v53  ;;  %v2502_v53 = vld [vmem:[%s4809_s5 + $0xc0] sm:$0xff]  ;;  %v2503_v54 = vld [vmem:[%s4809_s5 + $0xc8] sm:$0xff] }
 0x110   : > { %v792_v2 = vmax.f32 %v3788_v60, 0.0  ;;  %v2483_v60 = vld [vmem:[%s4807_s3 + $0x138] sm:$0xff] }
 0x111   : > { %v791_v3 = vmax.f32 %v3789_v62, 0.0  ;;  %v3498_v61 = vpack.c.bf16 %v2483_v60, %v2482_v59  ;;  %v2484_v62 = vld [vmem:[%s4807_s3 + $0x140] sm:$0xff]  ;;  %v1321_v60 = vld [vmem:[%s4811_s7 + $0x8] sm:$0xff] }
 0x112   : > { %v811_v9 = vrot.slane %v792_v2, 1  ;;  %v3501_v0 = vpack.c.bf16 %v2485_v63, %v2484_v62  ;;  %v1320_v59 = vld [vmem:[%s4811_s7] sm:$0xff]  ;;  %v1323_v63 = vld [vmem:[%s4811_s7 + $0x18] sm:$0xff] }
 0x113   : > { %v794_v4 = vrot.slane %v791_v3, 1  ;;  %v3549_v62 = vpack.c.bf16 %v1321_v60, %v1320_v59  ;;  %v2520_v60 = vld [vmem:[%s4811_s7 + $0xe0] sm:$0xff] }
 0x114   : > { %v813_v14 = vmax.f32 %v792_v2, %v811_v9  ;;  %v2487_v2 = vld [vmem:[%s4807_s3 + $0x158] sm:$0xff]  ;;  %v3507_v9 = vpack.c.bf16 %v1127_v7, %v1126_v6 }
 0x115   : > { %v796_v10 = vmax.f32 %v791_v3, %v794_v4  ;;  %v3504_v3 = vpack.c.bf16 %v2487_v2, %v2486_v1  ;;  %v2488_v4 = vld [vmem:[%s4807_s3 + $0x160] sm:$0xff]  ;;  %v1325_v2 = vld [vmem:[%s4811_s7 + $0x28] sm:$0xff]  ;;  %v1327_v6 = vld [vmem:[%s4811_s7 + $0x38] sm:$0xff] }
 0x116   : > { %3508 = vmatpush3.bf16.msra.mxu0 %v3507_v9  ;;  %v1324_v1 = vld [vmem:[%s4811_s7 + $0x20] sm:$0xff]  ;;  %v1329_v9 = vld [vmem:[%s4811_s7 + $0x48] sm:$0xff] }
 0x117   : > { %798 = vrot.lane.b32.xlu0 %v796_v10, %s3839_s25  ;;  %3509 = vmatprep.subr.bf16.mxu0 %v3838_v48 }
 0x11b   : > { %815 = vrot.lane.b32.xlu0 %v813_v14, %s3839_s25 }
 0x189   : > { %v799_v16 = vpop.permute.xlu0 %798 }
 0x18a   : > { %v801_v17 = vmax.f32 %v796_v10, %v799_v16  ;;  %v1129_v10 = vld [vmem:[%s4809_s5 + $0x18] sm:$0xff] }
 0x18b   : > { %v3510_v11 = vpack.c.bf16 %v1129_v10, %v1128_v8  ;;  %v1133_v16 = vld [vmem:[%s4809_s5 + $0x38] sm:$0xff]  ;;  %v1328_v8 = vld [vmem:[%s4811_s7 + $0x40] sm:$0xff] }
 0x18c   : > { %803 = vst.msk [vmem:[#allocation3] sm:$0x1] %vm802_vm2, %v801_v17  ;;  %v3561_v10 = vpack.c.bf16 %v1329_v9, %v1328_v8  ;;  %v2528_v9 = vld [vmem:[%s4811_s7 + $0x120] sm:$0xff] }
 0x18d   : > { %805 = vst.msk [vmem:[#allocation3 - $0x1] sm:$0x4] %vm804_vm4, %v801_v17  ;;  %v816_v18 = vpop.permute.xlu0 %815  ;;  %3511 = vmatpush3.bf16.msra.mxu0 %v3510_v11  ;;  %v1330_v11 = vld [vmem:[%s4811_s7 + $0x50] sm:$0xff] }
 0x18e   : > { %807 = vst.msk [vmem:[#allocation3 - $0x2] sm:$0x10] %vm806_vm5, %v801_v17  ;;  %v818_v19 = vmax.f32 %v813_v14, %v816_v18  ;;  %v3513_v14 = vpack.c.bf16 %v1131_v13, %v1130_v12  ;;  %3512 = vmatprep.subr.bf16.mxu0 %v3838_v48  ;;  %v1134_v18 = vld [vmem:[%s4809_s5 + $0x40] sm:$0xff]  ;;  %v1331_v12 = vld [vmem:[%s4811_s7 + $0x58] sm:$0xff] }
 0x18f   : > { %809 = vst.msk [vmem:[#allocation3 - $0x3] sm:$0x40] %vm808_vm6, %v801_v17  ;;  %v3516_v17 = vpack.c.bf16 %v1133_v16, %v1132_v15  ;;  %v3564_v13 = vpack.c.bf16 %v1331_v12, %v1330_v11  ;;  %v1333_v15 = vld [vmem:[%s4811_s7 + $0x68] sm:$0xff]  ;;  %v2530_v12 = vld [vmem:[%s4811_s7 + $0x130] sm:$0xff] }
 0x190   : > { %819 = vst.msk [vmem:[#allocation3 + $0x4] sm:$0x1] %vm802_vm2, %v818_v19 }
 0x191   : > { %820 = vst.msk [vmem:[#allocation3 + $0x3] sm:$0x4] %vm804_vm4, %v818_v19  ;;  %3514 = vmatpush3.bf16.msra.mxu0 %v3513_v14  ;;  %v1332_v14 = vld [vmem:[%s4811_s7 + $0x60] sm:$0xff] }
 0x192   : > { %821 = vst.msk [vmem:[#allocation3 + $0x2] sm:$0x10] %vm806_vm5, %v818_v19  ;;  %3515 = vmatprep.subr.bf16.mxu0 %v3838_v48  ;;  %v3567_v16 = vpack.c.bf16 %v1333_v15, %v1332_v14  ;;  %v2532_v15 = vld [vmem:[%s4811_s7 + $0x140] sm:$0xff] }
 0x193   : > { %822 = vst.msk [vmem:[#allocation3 + $0x1] sm:$0x40] %vm808_vm6, %v818_v19  ;;  %v1135_v19 = vld [vmem:[%s4809_s5 + $0x48] sm:$0xff] }
 0x195   : > { %3517 = vmatpush3.bf16.msra.mxu0 %v3516_v17  ;;  %v1334_v17 = vld [vmem:[%s4811_s7 + $0x70] sm:$0xff] }
 0x196   : > { %3518 = vmatprep.subr.bf16.mxu0 %v3838_v48 }
 0x19a   : > { %v823_v20 = vld [vmem:[#allocation3] sm:$0xff] }
 0x19b   : > { %827 = vst.msk [vmem:[#allocation2 + $0x1] sm:$0xff] %vm826_vm7, %v823_v20  ;;  %v3519_v20 = vpack.c.bf16 %v1135_v19, %v1134_v18  ;;  %v1335_v18 = vld [vmem:[%s4811_s7 + $0x78] sm:$0xff] }
 0x19c   : > { %v3570_v19 = vpack.c.bf16 %v1335_v18, %v1334_v17  ;;  %v2534_v18 = vld [vmem:[%s4811_s7 + $0x150] sm:$0xff] }
 0x19d   : > { %3520 = vmatpush3.bf16.msra.mxu0 %v3519_v20  ;;  %v1591_v20 = vld [vmem:[%s4813_s9] sm:$0xff] }
 0x19e   : > { %3521 = vmatprep.subr.bf16.mxu0 %v3838_v48 }
 0x1a2   : > { %v829_v26 = vld [vmem:[#allocation2] sm:$0xff] }
 0x1a3   : > { %v4104_v27 = vld [vmem:[#allocation2 + $0x2] sm:$0xff]  ;;  %2960 = vmatmul.mubr.msk.f32.vlgmr.msra.gmra.mrb[0].mxu1 %vm826_vm7, %v829_v26  ;;  %1315 = vst [vmem:[#allocation2] sm:$0x1] %v3837_v5 }
 0x1a4   : > { %1316 = vst [vmem:[#allocation2 + $0x9] sm:$0x1] %v3837_v5  ;;  %3466 = vmatpush3.bf16.msra.mxu1 %v3465_v23  ;;  %2992 = vmatprep.mubr.msk.f32.mxu1 %vm3840_vm3, %v3837_v5  ;;  %v925_v51 = vld [vmem:[#allocation2 + $0x1] sm:$0xff]  ;;  %v3522_v23 = vpack.c.bf16 %v1137_v22, %v1136_v21  ;;  %v1593_v22 = vld [vmem:[%s4813_s9 + $0x10] sm:$0xff] }
 0x1a5   : > { %3467 = vmatprep.subr.bf16.mxu1 %v3838_v48  ;;  %v1139_v26 = vld [vmem:[%s4809_s5 + $0x68] sm:$0xff] }
 0x1a6   : > { %3523 = vmatpush3.bf16.msra.mxu0 %v3522_v23  ;;  %v1592_v21 = vld [vmem:[%s4813_s9 + $0x8] sm:$0xff] }
 0x1a7   : > { %3524 = vmatprep.subr.bf16.mxu0 %v3838_v48  ;;  %v3621_v23 = vpack.c.bf16 %v1592_v21, %v1591_v20  ;;  %v2536_v21 = vld [vmem:[%s4811_s7 + $0x160] sm:$0xff] }
 0x1a8   : > { %3469 = vmatpush3.bf16.msra.mxu1 %v3468_v28 }
 0x1a9   : > { %3470 = vmatprep.subr.bf16.mxu1 %v3838_v48 }
 0x1ac   : > { %3472 = vmatpush3.bf16.msra.mxu1 %v3471_v31 }
 0x1ad   : > { %3473 = vmatprep.subr.bf16.mxu1 %v3838_v48 }
 0x1b0   : > { %3475 = vmatpush3.bf16.msra.mxu1 %v3474_v34 }
 0x1b1   : > { %3476 = vmatprep.subr.bf16.mxu1 %v3838_v48 }
 0x1b4   : > { %3478 = vmatpush3.bf16.msra.mxu1 %v3477_v37  ;;  %v2493_v37 = vld [vmem:[%s4809_s5 + $0x78] sm:$0xff] }
 0x1b5   : > { %3479 = vmatprep.subr.bf16.mxu1 %v3838_v48  ;;  %v3528_v38 = vpack.c.bf16 %v2493_v37, %v2492_v36 }
 0x1b8   : > { %3481 = vmatpush3.bf16.msra.mxu1 %v3480_v40  ;;  %v2495_v40 = vld [vmem:[%s4809_s5 + $0x88] sm:$0xff] }
 0x1b9   : > { %3482 = vmatprep.subr.bf16.mxu1 %v3838_v48  ;;  %v3531_v42 = vpack.c.bf16 %v2495_v40, %v2494_v39  ;;  %v2508_v40 = vld [vmem:[%s4811_s7 + $0x80] sm:$0xff] }
 0x1bc   : > { %3484 = vmatpush3.bf16.msra.mxu1 %v3483_v43  ;;  %v2496_v43 = vld [vmem:[%s4809_s5 + $0x90] sm:$0xff] }
 0x1bd   : > { %2990 = vmatprep.subr.mxu1 %v3837_v5  ;;  %v3534_v45 = vpack.c.bf16 %v2497_v44, %v2496_v43  ;;  %v2510_v43 = vld [vmem:[%s4811_s7 + $0x90] sm:$0xff]  ;;  %v2511_v44 = vld [vmem:[%s4811_s7 + $0x98] sm:$0xff] }
 0x1c0   : > { %2991 = vmatpush3.msra.mxu1 %v2472_v46  ;;  %v2498_v46 = vld [vmem:[%s4809_s5 + $0xa0] sm:$0xff] }
 0x1c1   : > { %2993 = vmatmul.mubr.msk.f32.vlgmr.msra.gmra.mrb[0].mxu1 %vm826_vm7, %v925_v51  ;;  %3485 = vmatprep.subr.bf16.mxu1 %v3838_v48  ;;  %v2501_v51 = vld [vmem:[%s4809_s5 + $0xb8] sm:$0xff] }
 0x1c2   : > { %3487 = vmatpush3.bf16.msra.mxu1 %v3486_v47  ;;  %3025 = vmatprep.mubr.msk.f32.mxu1 %vm3840_vm3, %v3837_v5  ;;  %v2499_v47 = vld [vmem:[%s4809_s5 + $0xa8] sm:$0xff] }
 0x1c3   : > { %3488 = vmatprep.subr.bf16.mxu1 %v3838_v48  ;;  %v3537_v49 = vpack.c.bf16 %v2499_v47, %v2498_v46  ;;  %v3576_v46 = vpack.c.bf16 %v2511_v44, %v2510_v43  ;;  %v2512_v47 = vld [vmem:[%s4811_s7 + $0xa0] sm:$0xff] }
 0x1c4   : > { %v1783_v44 = vld [vmem:[%s4815_s11] sm:$0xff] }
 0x1c6   : > { %3490 = vmatpush3.bf16.msra.mxu1 %v3489_v52  ;;  %v3540_v52 = vpack.c.bf16 %v2501_v51, %v2500_v50  ;;  %v2514_v51 = vld [vmem:[%s4811_s7 + $0xb0] sm:$0xff] }
 0x1c7   : > { %3491 = vmatprep.subr.bf16.mxu1 %v3838_v48 }
 0x1ca   : > { %3493 = vmatpush3.bf16.msra.mxu1 %v3492_v55  ;;  %v3543_v55 = vpack.c.bf16 %v2503_v54, %v2502_v53  ;;  %v2516_v54 = vld [vmem:[%s4811_s7 + $0xc0] sm:$0xff] }
 0x1cb   : > { %3494 = vmatprep.subr.bf16.mxu1 %v3838_v48 }
 0x1ce   : > { %3496 = vmatpush3.bf16.msra.mxu1 %v3495_v58  ;;  %v3546_v58 = vpack.c.bf16 %v2505_v57, %v2504_v56  ;;  %v2518_v57 = vld [vmem:[%s4811_s7 + $0xd0] sm:$0xff] }
 0x1cf   : > { %3497 = vmatprep.subr.bf16.mxu1 %v3838_v48 }
 0x1d2   : > { %3499 = vmatpush3.bf16.msra.mxu1 %v3498_v61  ;;  %v1322_v61 = vld [vmem:[%s4811_s7 + $0x10] sm:$0xff] }
 0x1d3   : > { %3500 = vmatprep.subr.bf16.mxu1 %v3838_v48 }
 0x1d6   : > { %3502 = vmatpush3.bf16.msra.mxu1 %v3501_v0  ;;  %v3552_v0 = vpack.c.bf16 %v1323_v63, %v1322_v61  ;;  %v2521_v61 = vld [vmem:[%s4811_s7 + $0xe8] sm:$0xff]  ;;  %v2522_v63 = vld [vmem:[%s4811_s7 + $0xf0] sm:$0xff] }
 0x1d7   : > { %3503 = vmatprep.subr.bf16.mxu1 %v3838_v48 }
 0x1da   : > { %3505 = vmatpush3.bf16.msra.mxu1 %v3504_v3  ;;  %v3555_v3 = vpack.c.bf16 %v1325_v2, %v1324_v1  ;;  %v2524_v2 = vld [vmem:[%s4811_s7 + $0x100] sm:$0xff] }
 0x1db   : > { %3023 = vmatprep.subr.mxu1 %v3837_v5 }
 0x1de   : > { %3024 = vmatpush3.msra.mxu1 %v2488_v4  ;;  %v1326_v4 = vld [vmem:[%s4811_s7 + $0x30] sm:$0xff] }
 0x1df   : > { %3026 = vmatmul.mubr.msk.f32.vlgmr.msra.gmra.mrb[0].mxu1 %vm826_vm7, %v4104_v27  ;;  %3548 = vmatprep.subr.bf16.mxu1 %v3838_v48  ;;  %v3525_v27 = vpack.c.bf16 %v1139_v26, %v1138_v25  ;;  %v3558_v7 = vpack.c.bf16 %v1327_v6, %v1326_v4  ;;  %v1595_v26 = vld [vmem:[%s4813_s9 + $0x20] sm:$0xff]  ;;  %v2526_v6 = vld [vmem:[%s4811_s7 + $0x110] sm:$0xff] }
 0x1e0   : > { %3122 = vmatprep.mubr.msk.f32.mxu1 %vm3840_vm3, %v3837_v5  ;;  %3550 = vmatpush3.bf16.msra.mxu1 %v3549_v62  ;;  %v3591_v62 = vpack.c.bf16 %v2521_v61, %v2520_v60  ;;  %v1794_v60 = vld [vmem:[%s4815_s11 + $0x58] sm:$0xff]  ;;  %v1795_v61 = vld [vmem:[%s4815_s11 + $0x60] sm:$0xff] }
 0x1e1   : > { %3526 = vmatpush3.bf16.msra.mxu0 %v3525_v27  ;;  %3551 = vmatprep.subr.bf16.mxu1 %v3838_v48  ;;  %v1596_v27 = vld [vmem:[%s4813_s9 + $0x28] sm:$0xff] }
 0x1e2   : > { %3527 = vmatprep.subr.bf16.mxu0 %v3838_v48 }
 0x1e4   : > { %3553 = vmatpush3.bf16.msra.mxu1 %v3552_v0  ;;  %v2523_v0 = vld [vmem:[%s4811_s7 + $0xf8] sm:$0xff] }
 0x1e5   : > { %3554 = vmatprep.subr.bf16.mxu1 %v3838_v48  ;;  %v3594_v1 = vpack.c.bf16 %v2523_v0, %v2522_v63  ;;  %v1796_v63 = vld [vmem:[%s4815_s11 + $0x68] sm:$0xff] }
 0x1e6   : > { %v3668_v0 = vpack.c.bf16 %v1796_v63, %v1795_v61  ;;  %v2581_v63 = vld [vmem:[%s4815_s11 + $0x168] sm:$0xff] }
 0x1e8   : > { %3556 = vmatpush3.bf16.msra.mxu1 %v3555_v3  ;;  %v2525_v3 = vld [vmem:[%s4811_s7 + $0x108] sm:$0xff] }
 0x1e9   : > { %3557 = vmatprep.subr.bf16.mxu1 %v3838_v48  ;;  %v3597_v4 = vpack.c.bf16 %v2525_v3, %v2524_v2  ;;  %v1798_v2 = vld [vmem:[%s4815_s11 + $0x78] sm:$0xff] }
 0x1ec   : > { %3559 = vmatpush3.bf16.msra.mxu1 %v3558_v7  ;;  %v2527_v7 = vld [vmem:[%s4811_s7 + $0x118] sm:$0xff] }
 0x1ed   : > { %3560 = vmatprep.subr.bf16.mxu1 %v3838_v48  ;;  %v3600_v8 = vpack.c.bf16 %v2527_v7, %v2526_v6  ;;  %v2553_v6 = vld [vmem:[%s4815_s11 + $0x88] sm:$0xff] }
 0x1f0   : > { %3562 = vmatpush3.bf16.msra.mxu1 %v3561_v10  ;;  %v2529_v10 = vld [vmem:[%s4811_s7 + $0x128] sm:$0xff] }
 0x1f1   : > { %3563 = vmatprep.subr.bf16.mxu1 %v3838_v48  ;;  %v3603_v11 = vpack.c.bf16 %v2529_v10, %v2528_v9  ;;  %v2082_v9 = vld [vmem:[%s4817_s13 + $0x8] sm:$0xff] }
 0x1f4   : > { %3565 = vmatpush3.bf16.msra.mxu1 %v3564_v13  ;;  %v2531_v13 = vld [vmem:[%s4811_s7 + $0x138] sm:$0xff] }
 0x1f5   : > { %3566 = vmatprep.subr.bf16.mxu1 %v3838_v48  ;;  %v3606_v14 = vpack.c.bf16 %v2531_v13, %v2530_v12 }
 0x1f8   : > { %3568 = vmatpush3.bf16.msra.mxu1 %v3567_v16  ;;  %v2533_v16 = vld [vmem:[%s4811_s7 + $0x148] sm:$0xff] }
 0x1f9   : > { %3569 = vmatprep.subr.bf16.mxu1 %v3838_v48  ;;  %v3609_v17 = vpack.c.bf16 %v2533_v16, %v2532_v15 }
 0x1fc   : > { %3571 = vmatpush3.bf16.msra.mxu1 %v3570_v19  ;;  %v2535_v19 = vld [vmem:[%s4811_s7 + $0x158] sm:$0xff] }
 0x1fd   : > { %3572 = vmatprep.subr.bf16.mxu1 %v3838_v48  ;;  %v3612_v20 = vpack.c.bf16 %v2535_v19, %v2534_v18 }
 0x2b2   : > { %v1102_v28 = vpop.f32.mrb[0].mxu1 }
 0x2b3   : > { %v3790_v29 = vadd.f32 %v2457_v24, %v1102_v28  ;;  %v3027_v30 = vpop.f32.mrb[1].mxu1  ;;  %v1594_v24 = vld [vmem:[%s4813_s9 + $0x18] sm:$0xff]  ;;  %v3627_v28 = vpack.c.bf16 %v1596_v27, %v1595_v26 }
 0x2b4   : > { %v3624_v25 = vpack.c.bf16 %v1594_v24, %v1593_v22  ;;  %v1598_v30 = vld [vmem:[%s4813_s9 + $0x38] sm:$0xff]  ;;  %v2537_v22 = vld [vmem:[%s4811_s7 + $0x168] sm:$0xff]  ;;  %v2538_v24 = vld [vmem:[%s4811_s7 + $0x170] sm:$0xff] }
 0x2b5   : > { %v1107_v31 = vmax.f32 %v3790_v29, 0.0  ;;  %v1597_v29 = vld [vmem:[%s4813_s9 + $0x30] sm:$0xff] }
 0x2b7   : > { %v1109_v32 = vrot.slane %v1107_v31, 1 }
 0x2b9   : > { %v1111_v33 = vmax.f32 %v1107_v31, %v1109_v32  ;;  %v3630_v31 = vpack.c.bf16 %v1598_v30, %v1597_v29  ;;  %v2490_v32 = vld [vmem:[%s4810_s6] ss:$0 sm:$0xff]  ;;  %v2543_v29 = vld [vmem:[%s4813_s9 + $0x48] sm:$0xff] }
 0x2ba   : > { %v2507_v30 = vld [vmem:[%s4812_s8] ss:$0 sm:$0xff] }
 0x2bb   : > { %1113 = vrot.lane.b32.xlu1 %v1111_v33, %s3841_s26 }
 0x32d   : > { %v1114_v34 = vpop.permute.xlu1 %1113 }
 0x32e   : > { %v1116_v35 = vmax.f32 %v1111_v33, %v1114_v34 }
 0x330   : > { %1118 = vst.msk [vmem:[#allocation3] sm:$0x1] %vm1117_vm8, %v1116_v35 }
 0x331   : > { %1120 = vst.msk [vmem:[#allocation3 - $0x1] sm:$0x4] %vm1119_vm9, %v1116_v35 }
 0x332   : > { %1122 = vst.msk [vmem:[#allocation3 - $0x2] sm:$0x10] %vm1121_vm10, %v1116_v35 }
 0x333   : > { %1124 = vst.msk [vmem:[#allocation3 - $0x3] sm:$0x40] %vm1123_vm11, %v1116_v35 }
 0x33a   : > { %v1125_v41 = vld [vmem:[#allocation3] sm:$0xf] }
 0x33b   : > { %3057 = vmatmul.mubr.msk.f32.vlgmr.msra.gmra.mrb[2].mxu0 %vm1147_vm12, %v1125_v41 }
 0x33c   : > { %3529 = vmatpush3.bf16.msra.mxu0 %v3528_v38  ;;  %3087 = vmatprep.mubr.msk.f32.mxu0 %vm3840_vm3, %v3837_v5 }
 0x33d   : > { %3530 = vmatprep.subr.bf16.mxu0 %v3838_v48 }
 0x340   : > { %3532 = vmatpush3.bf16.msra.mxu0 %v3531_v42 }
 0x341   : > { %3533 = vmatprep.subr.bf16.mxu0 %v3838_v48 }
 0x344   : > { %3535 = vmatpush3.bf16.msra.mxu0 %v3534_v45 }
 0x345   : > { %3536 = vmatprep.subr.bf16.mxu0 %v3838_v48 }
 0x348   : > { %3538 = vmatpush3.bf16.msra.mxu0 %v3537_v49  ;;  %v2513_v49 = vld [vmem:[%s4811_s7 + $0xa8] sm:$0xff] }
 0x349   : > { %3539 = vmatprep.subr.bf16.mxu0 %v3838_v48  ;;  %v3579_v50 = vpack.c.bf16 %v2513_v49, %v2512_v47  ;;  %v1785_v47 = vld [vmem:[%s4815_s11 + $0x10] sm:$0xff]  ;;  %v1787_v49 = vld [vmem:[%s4815_s11 + $0x20] sm:$0xff] }
 0x34c   : > { %3541 = vmatpush3.bf16.msra.mxu0 %v3540_v52  ;;  %v2515_v52 = vld [vmem:[%s4811_s7 + $0xb8] sm:$0xff] }
 0x34d   : > { %3542 = vmatprep.subr.bf16.mxu0 %v3838_v48  ;;  %v3582_v53 = vpack.c.bf16 %v2515_v52, %v2514_v51  ;;  %v1788_v51 = vld [vmem:[%s4815_s11 + $0x28] sm:$0xff] }
 0x34e   : > { %v3652_v52 = vpack.c.bf16 %v1788_v51, %v1787_v49  ;;  %v2572_v49 = vld [vmem:[%s4815_s11 + $0x120] sm:$0xff] }
 0x350   : > { %3544 = vmatpush3.bf16.msra.mxu0 %v3543_v55  ;;  %v2517_v55 = vld [vmem:[%s4811_s7 + $0xc8] sm:$0xff] }
 0x351   : > { %3545 = vmatprep.subr.bf16.mxu0 %v3838_v48  ;;  %v3585_v56 = vpack.c.bf16 %v2517_v55, %v2516_v54  ;;  %v1790_v54 = vld [vmem:[%s4815_s11 + $0x38] sm:$0xff] }
 0x354   : > { %3547 = vmatpush3.bf16.msra.mxu0 %v3546_v58  ;;  %v2519_v58 = vld [vmem:[%s4811_s7 + $0xd8] sm:$0xff] }
 0x355   : > { %3620 = vmatprep.subr.bf16.mxu0 %v3838_v48  ;;  %v3588_v59 = vpack.c.bf16 %v2519_v58, %v2518_v57  ;;  %v1792_v57 = vld [vmem:[%s4815_s11 + $0x48] sm:$0xff] }
 0x357   : > { %3088 = vmatmul.mubr.msk.f32.vlgmr.msra.gmra.mrb[4].mxu0 %vm1147_vm12, %v1125_v41  ;;  %v2509_v41 = vld [vmem:[%s4811_s7 + $0x88] sm:$0xff] }
 0x358   : > { %3211 = vmatprep.mubr.msk.f32.mxu0 %vm3840_vm3, %v3837_v5  ;;  %3622 = vmatpush3.bf16.msra.mxu0 %v3621_v23  ;;  %v3573_v42 = vpack.c.bf16 %v2509_v41, %v2508_v40  ;;  %v3615_v23 = vpack.c.bf16 %v2537_v22, %v2536_v21  ;;  %v2548_v41 = vld [vmem:[%s4813_s9 + $0x70] sm:$0xff]  ;;  %v2555_v21 = vld [vmem:[%s4815_s11 + $0x98] sm:$0xff] }
 0x359   : > { %3623 = vmatprep.subr.bf16.mxu0 %v3838_v48 }
 0x35c   : > { %3625 = vmatpush3.bf16.msra.mxu0 %v3624_v25  ;;  %v2539_v25 = vld [vmem:[%s4811_s7 + $0x178] sm:$0xff] }
 0x35d   : > { %3626 = vmatprep.subr.bf16.mxu0 %v3838_v48  ;;  %v3618_v26 = vpack.c.bf16 %v2539_v25, %v2538_v24  ;;  %v2556_v25 = vld [vmem:[%s4815_s11 + $0xa0] sm:$0xff] }
 0x360   : > { %3628 = vmatpush3.bf16.msra.mxu0 %v3627_v28  ;;  %v2542_v28 = vld [vmem:[%s4813_s9 + $0x40] sm:$0xff] }
 0x361   : > { %3629 = vmatprep.subr.bf16.mxu0 %v3838_v48 }
 0x364   : > { %3631 = vmatpush3.bf16.msra.mxu0 %v3630_v31 }
 0x365   : > { %3632 = vmatprep.subr.bf16.mxu0 %v3838_v48 }
 0x40e   : > { %v1217_v33 = vpop.f32.mrb[2].mxu0 }
 0x40f   : > { %v1218_v34 = vadd.f32 %v2490_v32, %v1217_v33  ;;  %v3058_v35 = vpop.f32.mrb[3].mxu0 }
 0x410   : > { %v2544_v35 = vld [vmem:[%s4813_s9 + $0x50] sm:$0xff] }
 0x411   : > { %1306 = vst [vmem:[#allocation3] sm:$0x1] %v1218_v34  ;;  %1308 = vst [vmem:[#allocation3 + $0x1] sm:$0x2] %v1218_v34 }
 0x412   : > { %1310 = vst [vmem:[#allocation3 + $0x2] sm:$0x4] %v1218_v34  ;;  %1312 = vst [vmem:[#allocation3 + $0x3] sm:$0x8] %v1218_v34 }
 0x42a   : > { %v1302_v36 = vpop.f32.mrb[4].mxu0 }
 0x42b   : > { %v1303_v37 = vadd.f32 %v2490_v32, %v1302_v36  ;;  %v3089_v38 = vpop.f32.mrb[5].mxu0  ;;  %v3633_v32 = vpack.c.bf16 %v2543_v29, %v2542_v28  ;;  %v2545_v36 = vld [vmem:[%s4813_s9 + $0x58] sm:$0xff]  ;;  %v2558_v29 = vld [vmem:[%s4815_s11 + $0xb0] sm:$0xff] }
 0x42c   : > { %v2546_v38 = vld [vmem:[%s4813_s9 + $0x60] sm:$0xff] }
 0x42d   : > { %1307 = vst [vmem:[#allocation3 + $0x1] sm:$0x1] %v1303_v37  ;;  %1309 = vst [vmem:[#allocation3 + $0x2] sm:$0x2] %v1303_v37 }
 0x42e   : > { %1311 = vst [vmem:[#allocation3 + $0x3] sm:$0x4] %v1303_v37  ;;  %1313 = vst [vmem:[#allocation3 + $0x4] sm:$0x8] %v1303_v37  ;;  %v3636_v37 = vpack.c.bf16 %v2545_v36, %v2544_v35  ;;  %v2563_v35 = vld [vmem:[%s4815_s11 + $0xd8] sm:$0xff] }
 0x435   : > { %v1314_v39 = vld [vmem:[#allocation3] sm:$0xff] }
 0x436   : > { %1317 = vst [vmem:[#allocation2 + $0x1] sm:$0xff] %v1314_v39 }
 0x43d   : > { %v1319_v45 = vld [vmem:[#allocation2] sm:$0xff] }
 0x43e   : > { %3123 = vmatmul.mubr.f32.vlgmr.msra.gmra.mrb[2].mxu1 %v1319_v45  ;;  %1776 = vst [vmem:[#allocation2] sm:$0x1] %v3837_v5  ;;  %v1502_v27 = vld [vmem:[#allocation2 + $0x2] sm:$0xff] }
 0x43f   : > { %3574 = vmatpush3.bf16.msra.mxu1 %v3573_v42  ;;  %3157 = vmatprep.mubr.msk.f32.mxu1 %vm3840_vm3, %v3837_v5  ;;  %v2549_v42 = vld [vmem:[%s4813_s9 + $0x78] sm:$0xff]  ;;  %v1784_v45 = vld [vmem:[%s4815_s11 + $0x8] sm:$0xff] }
 0x440   : > { %3575 = vmatprep.subr.bf16.mxu1 %v3838_v48  ;;  %v3642_v43 = vpack.c.bf16 %v2549_v42, %v2548_v41  ;;  %v2567_v41 = vld [vmem:[%s4815_s11 + $0xf8] sm:$0xff] }
 0x443   : > { %3577 = vmatpush3.bf16.msra.mxu1 %v3576_v46  ;;  %v3644_v46 = vpack.c.bf16 %v1784_v45, %v1783_v44  ;;  %v2569_v44 = vld [vmem:[%s4815_s11 + $0x108] sm:$0xff] }
 0x444   : > { %3578 = vmatprep.subr.bf16.mxu1 %v3838_v48 }
 0x447   : > { %3580 = vmatpush3.bf16.msra.mxu1 %v3579_v50 }
 0x448   : > { %3581 = vmatprep.subr.bf16.mxu1 %v3838_v48 }
 0x44b   : > { %3583 = vmatpush3.bf16.msra.mxu1 %v3582_v53  ;;  %v1789_v53 = vld [vmem:[%s4815_s11 + $0x30] sm:$0xff] }
 0x44c   : > { %3584 = vmatprep.subr.bf16.mxu1 %v3838_v48  ;;  %v3656_v55 = vpack.c.bf16 %v1790_v54, %v1789_v53  ;;  %v2574_v53 = vld [vmem:[%s4815_s11 + $0x130] sm:$0xff]  ;;  %v2575_v54 = vld [vmem:[%s4815_s11 + $0x138] sm:$0xff] }
 0x44f   : > { %3586 = vmatpush3.bf16.msra.mxu1 %v3585_v56  ;;  %v1791_v56 = vld [vmem:[%s4815_s11 + $0x40] sm:$0xff] }
 0x450   : > { %3587 = vmatprep.subr.bf16.mxu1 %v3838_v48  ;;  %v3660_v58 = vpack.c.bf16 %v1792_v57, %v1791_v56  ;;  %v2576_v56 = vld [vmem:[%s4815_s11 + $0x140] sm:$0xff]  ;;  %v2577_v57 = vld [vmem:[%s4815_s11 + $0x148] sm:$0xff] }
 0x453   : > { %3589 = vmatpush3.bf16.msra.mxu1 %v3588_v59  ;;  %v1793_v59 = vld [vmem:[%s4815_s11 + $0x50] sm:$0xff] }
 0x454   : > { %3590 = vmatprep.subr.bf16.mxu1 %v3838_v48 }
 0x457   : > { %3592 = vmatpush3.bf16.msra.mxu1 %v3591_v62  ;;  %v3664_v62 = vpack.c.bf16 %v1794_v60, %v1793_v59  ;;  %v2578_v59 = vld [vmem:[%s4815_s11 + $0x150] sm:$0xff]  ;;  %v2579_v60 = vld [vmem:[%s4815_s11 + $0x158] sm:$0xff] }
 0x458   : > { %3593 = vmatprep.subr.bf16.mxu1 %v3838_v48  ;;  %v3728_v61 = vpack.c.bf16 %v2579_v60, %v2578_v59 }
 0x45b   : > { %3595 = vmatpush3.bf16.msra.mxu1 %v3594_v1  ;;  %v1797_v1 = vld [vmem:[%s4815_s11 + $0x70] sm:$0xff] }
 0x45c   : > { %3596 = vmatprep.subr.bf16.mxu1 %v3838_v48  ;;  %v3672_v3 = vpack.c.bf16 %v1798_v2, %v1797_v1  ;;  %v2582_v1 = vld [vmem:[%s4815_s11 + $0x170] sm:$0xff]  ;;  %v2583_v2 = vld [vmem:[%s4815_s11 + $0x178] sm:$0xff] }
 0x45e   : > { %3158 = vmatmul.mubr.f32.vlgmr.msra.gmra.mrb[2].mxu1 %v1314_v39  ;;  %v2547_v39 = vld [vmem:[%s4813_s9 + $0x68] sm:$0xff] }
 0x45f   : > { %3598 = vmatpush3.bf16.msra.mxu1 %v3597_v4  ;;  %3192 = vmatprep.mubr.msk.f32.mxu1 %vm3840_vm3, %v3837_v5  ;;  %v3639_v40 = vpack.c.bf16 %v2547_v39, %v2546_v38  ;;  %v2552_v4 = vld [vmem:[%s4815_s11 + $0x80] sm:$0xff]  ;;  %v2565_v38 = vld [vmem:[%s4815_s11 + $0xe8] sm:$0xff] }
 0x460   : > { %3599 = vmatprep.subr.bf16.mxu1 %v3838_v48  ;;  %v3676_v7 = vpack.c.bf16 %v2553_v6, %v2552_v4  ;;  %v2083_v4 = vld [vmem:[%s4817_s13 + $0x10] sm:$0xff]  ;;  %v2084_v6 = vld [vmem:[%s4817_s13 + $0x18] sm:$0xff] }
 0x463   : > { %3601 = vmatpush3.bf16.msra.mxu1 %v3600_v8  ;;  %v2081_v8 = vld [vmem:[%s4817_s13] sm:$0xff] }
 0x464   : > { %3602 = vmatprep.subr.bf16.mxu1 %v3838_v48  ;;  %v3740_v10 = vpack.c.bf16 %v2082_v9, %v2081_v8  ;;  %v2085_v8 = vld [vmem:[%s4817_s13 + $0x20] sm:$0xff]  ;;  %v2086_v9 = vld [vmem:[%s4817_s13 + $0x28] sm:$0xff] }
 0x467   : > { %3604 = vmatpush3.bf16.msra.mxu1 %v3603_v11  ;;  %v2540_v11 = vld [vmem:[%s4814_s10] ss:$0 sm:$0xff] }
 0x468   : > { %3605 = vmatprep.subr.bf16.mxu1 %v3838_v48 }
 0x46b   : > { %3607 = vmatpush3.bf16.msra.mxu1 %v3606_v14 }
 0x46c   : > { %3608 = vmatprep.subr.bf16.mxu1 %v3838_v48 }
 0x46f   : > { %3610 = vmatpush3.bf16.msra.mxu1 %v3609_v17 }
 0x470   : > { %3611 = vmatprep.subr.bf16.mxu1 %v3838_v48 }
 0x473   : > { %3613 = vmatpush3.bf16.msra.mxu1 %v3612_v20  ;;  %v2554_v20 = vld [vmem:[%s4815_s11 + $0x90] sm:$0xff] }
 0x474   : > { %3614 = vmatprep.subr.bf16.mxu1 %v3838_v48  ;;  %v3680_v24 = vpack.c.bf16 %v2555_v21, %v2554_v20 }
 0x477   : > { %3616 = vmatpush3.bf16.msra.mxu1 %v3615_v23 }
 0x478   : > { %3617 = vmatprep.subr.bf16.mxu1 %v3838_v48 }
 0x47b   : > { %3619 = vmatpush3.bf16.msra.mxu1 %v3618_v26  ;;  %v2557_v26 = vld [vmem:[%s4815_s11 + $0xa8] sm:$0xff] }
 0x47c   : > { %3741 = vmatprep.subr.bf16.mxu1 %v3740_v10  ;;  %v3684_v28 = vpack.c.bf16 %v2557_v26, %v2556_v25 }
 0x47e   : > { %3193 = vmatmul.mubr.f32.vlgmr.msra.gmra.mrb[2].mxu1 %v1502_v27 }
 0x47f   : > { %3743 = vmatpush3.bf16.msra.mxu1 %v3740_v10  ;;  %v3748_v10 = vpack.c.bf16 %v2086_v9, %v2085_v8 }
 0x551   : > { %v1586_v31 = vpop.f32.mrb[2].mxu1 }
 0x552   : > { %v3791_v33 = vadd.f32 %v2507_v30, %v1586_v31  ;;  %v3194_v34 = vpop.f32.mrb[3].mxu1  ;;  %v2559_v30 = vld [vmem:[%s4815_s11 + $0xb8] sm:$0xff] }
 0x553   : > { %v3688_v31 = vpack.c.bf16 %v2559_v30, %v2558_v29  ;;  %v2562_v34 = vld [vmem:[%s4815_s11 + $0xd0] sm:$0xff] }
 0x554   : > { %3212 = vmatmul.mubr.msk.f32.vlgmr.msra.gmra.mrb[6].mxu0 %vm500_vm1, %v3791_v33  ;;  %v3696_v36 = vpack.c.bf16 %v2563_v35, %v2562_v34  ;;  %v2598_v34 = vld [vmem:[%s4817_s13 + $0x88] sm:$0xff] }
 0x555   : > { %3634 = vmatpush3.bf16.msra.mxu0 %v3633_v32  ;;  %3230 = vmatprep.mubr.msk.f32.mxu0 %vm3840_vm3, %v3837_v5  ;;  %v2560_v32 = vld [vmem:[%s4815_s11 + $0xc0] sm:$0xff] }
 0x556   : > { %3635 = vmatprep.subr.bf16.mxu0 %v3838_v48 }
 0x559   : > { %3637 = vmatpush3.bf16.msra.mxu0 %v3636_v37  ;;  %v2564_v37 = vld [vmem:[%s4815_s11 + $0xe0] sm:$0xff] }
 0x55a   : > { %3638 = vmatprep.subr.bf16.mxu0 %v3838_v48  ;;  %v3700_v39 = vpack.c.bf16 %v2565_v38, %v2564_v37  ;;  %v2600_v37 = vld [vmem:[%s4817_s13 + $0x98] sm:$0xff] }
 0x55d   : > { %3640 = vmatpush3.bf16.msra.mxu0 %v3639_v40  ;;  %v2566_v40 = vld [vmem:[%s4815_s11 + $0xf0] sm:$0xff] }
 0x55e   : > { %3641 = vmatprep.subr.bf16.mxu0 %v3838_v48  ;;  %v1786_v48 = vld [vmem:[%s4815_s11 + $0x18] sm:$0xff]  ;;  %v3704_v42 = vpack.c.bf16 %v2567_v41, %v2566_v40  ;;  %v2601_v40 = vld [vmem:[%s4817_s13 + $0xa0] sm:$0xff]  ;;  %v2602_v41 = vld [vmem:[%s4817_s13 + $0xa8] sm:$0xff] }
 0x55f   : > { %v3648_v50 = vpack.c.bf16 %v1786_v48, %v1785_v47  ;;  %v2571_v47 = vld [vmem:[%s4815_s11 + $0x118] sm:$0xff] }
 0x561   : > { %3643 = vmatpush3.bf16.msra.mxu0 %v3642_v43  ;;  %v2568_v43 = vld [vmem:[%s4815_s11 + $0x100] sm:$0xff] }
 0x562   : > { %3645 = vmatprep.subr.bf16.mxu0 %v3644_v46  ;;  %v3708_v45 = vpack.c.bf16 %v2569_v44, %v2568_v43  ;;  %v3780_v43 = vpack.c.bf16 %v2602_v41, %v2601_v40  ;;  %v2603_v44 = vld [vmem:[%s4817_s13 + $0xb0] sm:$0xff] }
 0x564   : > { %3231 = vmatmul.mubr.msk.f32.vlgmr.msra.gmra.mrb[8].mxu0 %vm500_vm1, %v3791_v33 }
 0x565   : > { %3647 = vmatpush3.bf16.msra.mxu0 %v3644_v46  ;;  %v2570_v46 = vld [vmem:[%s4815_s11 + $0x110] sm:$0xff] }
 0x566   : > { %3649 = vmatprep.subr.bf16.mxu0 %v3648_v50  ;;  %v3712_v48 = vpack.c.bf16 %v2571_v47, %v2570_v46 }
 0x569   : > { %3651 = vmatpush3.bf16.msra.mxu0 %v3648_v50  ;;  %v2573_v50 = vld [vmem:[%s4815_s11 + $0x128] sm:$0xff] }
 0x56a   : > { %3653 = vmatprep.subr.bf16.mxu0 %v3652_v52 }
 0x56d   : > { %3655 = vmatpush3.bf16.msra.mxu0 %v3652_v52  ;;  %v3716_v52 = vpack.c.bf16 %v2573_v50, %v2572_v49 }
 0x56e   : > { %3657 = vmatprep.subr.bf16.mxu0 %v3656_v55 }
 0x571   : > { %3659 = vmatpush3.bf16.msra.mxu0 %v3656_v55  ;;  %v3720_v55 = vpack.c.bf16 %v2575_v54, %v2574_v53 }
 0x572   : > { %3661 = vmatprep.subr.bf16.mxu0 %v3660_v58 }
 0x575   : > { %3663 = vmatpush3.bf16.msra.mxu0 %v3660_v58  ;;  %v3724_v58 = vpack.c.bf16 %v2577_v57, %v2576_v56 }
 0x576   : > { %3665 = vmatprep.subr.bf16.mxu0 %v3664_v62 }
 0x579   : > { %3667 = vmatpush3.bf16.msra.mxu0 %v3664_v62  ;;  %v2580_v62 = vld [vmem:[%s4815_s11 + $0x160] sm:$0xff] }
 0x57a   : > { %3669 = vmatprep.subr.bf16.mxu0 %v3668_v0 }
 0x57d   : > { %3671 = vmatpush3.bf16.msra.mxu0 %v3668_v0  ;;  %v3732_v0 = vpack.c.bf16 %v2581_v63, %v2580_v62 }
 0x57e   : > { %3673 = vmatprep.subr.bf16.mxu0 %v3672_v3 }
 0x581   : > { %3675 = vmatpush3.bf16.msra.mxu0 %v3672_v3  ;;  %v3736_v3 = vpack.c.bf16 %v2583_v2, %v2582_v1 }
 0x582   : > { %3677 = vmatprep.subr.bf16.mxu0 %v3676_v7 }
 0x627   : > { %v1675_v12 = vpop.f32.mrb[6].mxu0 }
 0x628   : > { %v1676_v13 = vadd.f32 %v2540_v11, %v1675_v12  ;;  %v3213_v14 = vpop.f32.mrb[7].mxu0  ;;  %v2088_v12 = vld [vmem:[%s4817_s13 + $0x38] sm:$0xff] }
 0x629   : > { %v2587_v14 = vld [vmem:[%s4817_s13 + $0x40] sm:$0xff] }
 0x62a   : > { %1758 = vst [vmem:[#allocation3] ss:$8 sps:$4 sm:$0x11] %v1676_v13   ;;  %1760 = vst [vmem:[#allocation3 + $0x1] ss:$8 sps:$4 sm:$0x22] %v1676_v13  }
 0x62b   : > { %1762 = vst [vmem:[#allocation3 + $0x2] ss:$8 sps:$4 sm:$0x44] %v1676_v13   ;;  %1764 = vst [vmem:[#allocation3 + $0x3] ss:$8 sps:$4 sm:$0x88] %v1676_v13  }
 0x637   : > { %v1754_v15 = vpop.f32.mrb[8].mxu0 }
 0x638   : > { %v1755_v16 = vadd.f32 %v2540_v11, %v1754_v15  ;;  %v3232_v17 = vpop.f32.mrb[9].mxu0  ;;  %v2087_v11 = vld [vmem:[%s4817_s13 + $0x30] sm:$0xff]  ;;  %v2588_v15 = vld [vmem:[%s4817_s13 + $0x48] sm:$0xff] }
 0x639   : > { %v3752_v13 = vpack.c.bf16 %v2088_v12, %v2087_v11  ;;  %v2551_v17 = vld [vmem:[%s4816_s12] ss:$0 sm:$0xff] }
 0x63a   : > { %1759 = vst [vmem:[#allocation3 + $0x1] ss:$8 sps:$4 sm:$0x11] %v1755_v16   ;;  %1761 = vst [vmem:[#allocation3 + $0x2] ss:$8 sps:$4 sm:$0x22] %v1755_v16  }
 0x63b   : > { %1763 = vst [vmem:[#allocation3 + $0x3] ss:$8 sps:$4 sm:$0x44] %v1755_v16   ;;  %1765 = vst [vmem:[#allocation3 + $0x4] ss:$8 sps:$4 sm:$0x88] %v1755_v16   ;;  %v3756_v16 = vpack.c.bf16 %v2588_v15, %v2587_v14 }
 0x642   : > { %v1774_v18 = vld [vmem:[#allocation3] sm:$0xff]  ;;  %v1775_v19 = vld [vmem:[#allocation3 + $0x8] sm:$0xff] }
 0x643   : > { %1778 = vst [vmem:[#allocation2 + $0x1] sm:$0xff] %v1774_v18  ;;  %1779 = vst [vmem:[#allocation2 + $0x9] sm:$0xff] %v1775_v19 }
 0x64a   : > { %v1781_v22 = vld [vmem:[#allocation2] sm:$0xff]  ;;  %v1782_v23 = vld [vmem:[#allocation2 + $0x8] sm:$0xff] }
 0x64b   : > { %3265 = vmatprep.mubr.f32.mxu0 %v1781_v22  ;;  %2074 = vst.msk [vmem:[#allocation2] sm:$0x1] %vm497_vm0, %v3837_v5  ;;  %v4633_v27 = vld [vmem:[#allocation2 + $0xa] sm:$0xff]  ;;  %v1978_v51 = vld [vmem:[#allocation2 + $0x2] sm:$0xff] }
 0x64c   : > { %3266 = vmatmul.mubr.f32.vlgmr.msra.gmra.mrb[10].mxu0 %v1782_v23  ;;  %2075 = vst.msk [vmem:[#allocation2 + $0x11] sm:$0x1] %vm497_vm0, %v3837_v5  ;;  %v2561_v5 = vld [vmem:[%s4815_s11 + $0xc8] sm:$0xff]  ;;  %v2589_v22 = vld [vmem:[%s4817_s13 + $0x50] sm:$0xff]  ;;  %v2590_v23 = vld [vmem:[%s4817_s13 + $0x58] sm:$0xff] }
 0x64d   : > { %3679 = vmatpush3.bf16.msra.mxu0 %v3676_v7  ;;  %3300 = vmatprep.mubr.f32.mxu0 %v1774_v18  ;;  %v3692_v33 = vpack.c.bf16 %v2561_v5, %v2560_v32  ;;  %v3744_v7 = vpack.c.bf16 %v2084_v6, %v2083_v4  ;;  %v3760_v26 = vpack.c.bf16 %v2590_v23, %v2589_v22  ;;  %v2594_v32 = vld [vmem:[%s4817_s13 + $0x78] sm:$0xff] }
 0x64e   : > { %3681 = vmatprep.subr.bf16.mxu0 %v3680_v24 }
 0x64f   : > { %3745 = vmatprep.subr.bf16.mxu1 %v3744_v7 }
 0x650   : > { %3747 = vmatpush3.bf16.msra.mxu1 %v3744_v7 }
 0x651   : > { %3683 = vmatpush3.bf16.msra.mxu0 %v3680_v24  ;;  %3749 = vmatprep.subr.bf16.mxu1 %v3748_v10 }
 0x652   : > { %3685 = vmatprep.subr.bf16.mxu0 %v3684_v28 }
 0x654   : > { %3751 = vmatpush3.bf16.msra.mxu1 %v3748_v10 }
 0x655   : > { %3687 = vmatpush3.bf16.msra.mxu0 %v3684_v28  ;;  %3753 = vmatprep.subr.bf16.mxu1 %v3752_v13  ;;  %v2592_v28 = vld [vmem:[%s4817_s13 + $0x68] sm:$0xff] }
 0x656   : > { %3689 = vmatprep.subr.bf16.mxu0 %v3688_v31 }
 0x658   : > { %3755 = vmatpush3.bf16.msra.mxu1 %v3752_v13 }
 0x659   : > { %3691 = vmatpush3.bf16.msra.mxu0 %v3688_v31  ;;  %3757 = vmatprep.subr.bf16.mxu1 %v3756_v16  ;;  %v2593_v31 = vld [vmem:[%s4817_s13 + $0x70] sm:$0xff] }
 0x65a   : > { %3693 = vmatprep.subr.bf16.mxu0 %v3692_v33  ;;  %v3768_v5 = vpack.c.bf16 %v2594_v32, %v2593_v31 }
 0x65d   : > { %3695 = vmatpush3.bf16.msra.mxu0 %v3692_v33  ;;  %v2597_v33 = vld [vmem:[%s4817_s13 + $0x80] sm:$0xff] }
 0x65e   : > { %3697 = vmatprep.subr.bf16.mxu0 %v3696_v36  ;;  %v3772_v35 = vpack.c.bf16 %v2598_v34, %v2597_v33 }
 0x661   : > { %3699 = vmatpush3.bf16.msra.mxu0 %v3696_v36  ;;  %v2599_v36 = vld [vmem:[%s4817_s13 + $0x90] sm:$0xff] }
 0x662   : > { %3701 = vmatprep.subr.bf16.mxu0 %v3700_v39  ;;  %v3776_v38 = vpack.c.bf16 %v2600_v37, %v2599_v36 }
 0x665   : > { %3703 = vmatpush3.bf16.msra.mxu0 %v3700_v39 }
 0x666   : > { %3705 = vmatprep.subr.bf16.mxu0 %v3704_v42 }
 0x669   : > { %3707 = vmatpush3.bf16.msra.mxu0 %v3704_v42 }
 0x66a   : > { %3709 = vmatprep.subr.bf16.mxu0 %v3708_v45 }
 0x66c   : > { %3301 = vmatmul.mubr.f32.vlgmr.msra.gmra.mrb[10].mxu0 %v1775_v19 }
 0x66d   : > { %3711 = vmatpush3.bf16.msra.mxu0 %v3708_v45  ;;  %3335 = vmatprep.mubr.f32.mxu0 %v1978_v51  ;;  %v2604_v45 = vld [vmem:[%s4817_s13 + $0xb8] sm:$0xff] }
 0x66e   : > { %3713 = vmatprep.subr.bf16.mxu0 %v3712_v48  ;;  %v3784_v46 = vpack.c.bf16 %v2604_v45, %v2603_v44 }
 0x671   : > { %3715 = vmatpush3.bf16.msra.mxu0 %v3712_v48  ;;  %v2586_v48 = vld [vmem:[%s4818_s14] ss:$0 sm:$0xff] }
 0x672   : > { %3717 = vmatprep.subr.bf16.mxu0 %v3716_v52 }
 0x675   : > { %3719 = vmatpush3.bf16.msra.mxu0 %v3716_v52 }
 0x676   : > { %3721 = vmatprep.subr.bf16.mxu0 %v3720_v55 }
 0x679   : > { %3723 = vmatpush3.bf16.msra.mxu0 %v3720_v55 }
 0x67a   : > { %3725 = vmatprep.subr.bf16.mxu0 %v3724_v58 }
 0x67d   : > { %3727 = vmatpush3.bf16.msra.mxu0 %v3724_v58 }
 0x67e   : > { %3729 = vmatprep.subr.bf16.mxu0 %v3728_v61 }
 0x681   : > { %3731 = vmatpush3.bf16.msra.mxu0 %v3728_v61 }
 0x682   : > { %3733 = vmatprep.subr.bf16.mxu0 %v3732_v0 }
 0x685   : > { %3735 = vmatpush3.bf16.msra.mxu0 %v3732_v0 }
 0x686   : > { %3737 = vmatprep.subr.bf16.mxu0 %v3736_v3 }
 0x689   : > { %3739 = vmatpush3.bf16.msra.mxu0 %v3736_v3 }
 0x68c   : > { %3336 = vmatmul.mubr.f32.vlgmr.msra.gmra.mrb[10].mxu0 %v4633_v27  ;;  %v2591_v27 = vld [vmem:[%s4817_s13 + $0x60] sm:$0xff] }
 0x68d   : > { %v3764_v30 = vpack.c.bf16 %v2592_v28, %v2591_v27 }
 0x75f   : > { %v3337_v18 = vpop.f32.mrb[10].mxu0 }
 0x760   : > { %v3792_v19 = vadd.f32 %v3337_v18, %v2551_v17  ;;  %v2063_v20 = vpop.f32.mrb[11].mxu0 }
 0x761   : > { %v3793_v21 = vadd.f32 %v2551_v17, %v2063_v20 }
 0x762   : > { %2077 = vst.msk [vmem:[#allocation2 + $0x9] sm:$0xff] %vm500_vm1, %v3792_v19 }
 0x763   : > { %2076 = vst.msk [vmem:[#allocation2 + $0x1] sm:$0xff] %vm500_vm1, %v3793_v21 }
 0x769   : > { %v2179_v39 = vld [vmem:[#allocation2 + $0x9] sm:$0xff] }
 0x76a   : > { %v2079_v24 = vld [vmem:[#allocation2] sm:$0xff]  ;;  %v2080_v25 = vld [vmem:[#allocation2 + $0x8] sm:$0xff] }
 0x76b   : > { %3354 = vmatprep.mubr.msk.f32.mxu1 %vm500_vm1, %v2079_v24  ;;  %v2178_v29 = vld [vmem:[#allocation2 + $0x1] sm:$0xff]  ;;  %v2273_v47 = vld [vmem:[#allocation2 + $0xa] sm:$0xff] }
 0x76c   : > { %3355 = vmatmul.mubr.msk.f32.vlgmr.msra.gmra.mrb[4].mxu1 %vm500_vm1, %v2080_v25  ;;  %v2272_v42 = vld [vmem:[#allocation2 + $0x2] sm:$0xff] }
 0x76d   : > { %3759 = vmatpush3.bf16.msra.mxu1 %v3756_v16  ;;  %3373 = vmatprep.mubr.msk.f32.mxu1 %vm500_vm1, %v2178_v29 }
 0x76e   : > { %3761 = vmatprep.subr.bf16.mxu1 %v3760_v26 }
 0x771   : > { %3763 = vmatpush3.bf16.msra.mxu1 %v3760_v26 }
 0x772   : > { %3765 = vmatprep.subr.bf16.mxu1 %v3764_v30 }
 0x775   : > { %3767 = vmatpush3.bf16.msra.mxu1 %v3764_v30 }
 0x776   : > { %3769 = vmatprep.subr.bf16.mxu1 %v3768_v5 }
 0x779   : > { %3771 = vmatpush3.bf16.msra.mxu1 %v3768_v5 }
 0x77a   : > { %3773 = vmatprep.subr.bf16.mxu1 %v3772_v35 }
 0x77c   : > { %3374 = vmatmul.mubr.msk.f32.vlgmr.msra.gmra.mrb[4].mxu1 %vm500_vm1, %v2179_v39 }
 0x77d   : > { %3775 = vmatpush3.bf16.msra.mxu1 %v3772_v35  ;;  %3392 = vmatprep.mubr.msk.f32.mxu1 %vm500_vm1, %v2272_v42 }
 0x77e   : > { %3777 = vmatprep.subr.bf16.mxu1 %v3776_v38 }
 0x781   : > { %3779 = vmatpush3.bf16.msra.mxu1 %v3776_v38 }
 0x782   : > { %3781 = vmatprep.subr.bf16.mxu1 %v3780_v43 }
 0x785   : > { %3783 = vmatpush3.bf16.msra.mxu1 %v3780_v43 }
 0x786   : > { %3785 = vmatprep.subr.bf16.mxu1 %v3784_v46 }
 0x789   : > { %3787 = vmatpush3.bf16.msra.mxu1 %v3784_v46 }
 0x78c   : > { %3393 = vmatmul.mubr.msk.f32.vlgmr.msra.gmra.mrb[4].mxu1 %vm500_vm1, %v2273_v47 }
 0x85f   : > { %v3394_v49 = vpop.f32.mrb[4].mxu1 }
 0x860   : > { %v3794_v50 = vadd.f32 %v3394_v49, %v2586_v48  ;;  %v2355_v51 = vpop.f32.mrb[5].mxu1 }
 0x861   : > { %v3795_v52 = vadd.f32 %v2586_v48, %v2355_v51 }
 0x862   : > { %2368 = vst.msk [vmem:[%s494_s27 + $0x8] sm:$0xff] %vm2366_vm13, %v3794_v50 }
 0x863   : > { %2367 = vst.msk [vmem:[%s494_s27] sm:$0xff] %vm2366_vm13, %v3795_v52 }
 0x864 PF: > { %s25_s18 = sadd.s32 1, %s3835_s18  }
 0x865   : > { %p22_p4 = scmp.ge.s32.totalorder %s25_s18, 4  }
 0x867   :  { %24 = sbr.rel (!%p22_p4) target bundleno = 1 (0x1), region = 122 }

</bundles_post_ra>
